<compile_context>
chip_gen: v5e
topology: v5e:2x2
jax: 0.10.0
libtpu: 0.0.40
codegen_flags: <defaults>
</compile_context>

<pallas_src>
import functools

import jax
import jax.numpy as jnp
from jax import lax
from jax.experimental import pallas as pl
from jax.experimental.pallas import tpu as pltpu


_NEG_BIG = -1e30  # finite "-inf" substitute: avoids NaN from (-inf) - (-inf)


def _round_up(x, m):
    return (x + m - 1) // m * m


def _device_kind():
    try:
        return jax.devices()[0].device_kind.lower()
    except Exception:
        return ""


@functools.lru_cache(maxsize=None)
def _int8_mxu_ok():
    """One-time probe: does the int8 MXU path lower & run on this chip/runtime?"""
    def _k(a_ref, b_ref, o_ref):
        o_ref[...] = lax.dot_general(a_ref[...], b_ref[...], (((1,), (1,)), ((), ())),
                                     preferred_element_type=jnp.int32)
    try:
        a = jnp.ones((128, 128), jnp.int8)
        out = pl.pallas_call(_k, out_shape=jax.ShapeDtypeStruct((128, 128), jnp.int32))(a, a)
        out = jax.block_until_ready(out)
        return bool(out[0, 0] == 128)
    except Exception:
        return False


def _pick_asso_dtype(kind):
    # v5*/v6*: int8 MXU path is faster and halves the streamed one-hot bytes.
    # v7x has no integer MXU path -> keep bf16 (exact for {-1,0,+1} / one-hot).
    # TODO(synk): fp8 (e4m3) association operands on v7x.
    if ("v5" in kind or "v6" in kind) and _int8_mxu_ok():
        return jnp.int8
    return jnp.bfloat16


def _choose_tiles(n, row_cap, col_cap, two_core):
    """Pick (tm, tn, n_pad): big tiles, bounded padding, divisible grid."""
    n128 = _round_up(n, 128)
    row_cap = max(128, min(row_cap // 128 * 128, n128))
    col_cap = max(128, min(col_cap // 128 * 128, n128))

    # Row tile: largest multiple of 128 <= cap whose padding waste stays <= 12.5%
    # over the 128-rounded size (t=128 always qualifies, so this always resolves).
    budget = n128 + n128 // 8
    tm, n_pad = 128, n128
    for t in range(row_cap, 127, -128):
        cand = _round_up(n128, t)
        if cand <= budget:
            tm, n_pad = t, cand
            break

    # 2-TC chips (v7x): prefer >= 2 row tiles so the "parallel" axis spans both cores.
    if two_core and n_pad // tm < 2:
        for t in range(tm - 128, 127, -128):
            if n_pad % t == 0:
                tm = t
                break

    # Column tile: largest multiple of 128 <= cap that divides n_pad.
    tn = 128
    for t in range(min(col_cap, n_pad), 127, -128):
        if n_pad % t == 0:
            tn = t
            break
    return tm, tn, n_pad


def _supcon_kernel(f_row_ref, f_col_ref, a_row_ref, oh_col_ref, out_ref,
                   m_ref, l_ref, cnt_ref, sl_ref,
                   *, n_valid, tm, tn):
    i = pl.program_id(0)          # row tile
    j = pl.program_id(1)          # column (reduction) tile

    @pl.when(j == 0)
    def _init():
        m_ref[...] = jnp.full_like(m_ref, _NEG_BIG)
        l_ref[...] = jnp.zeros_like(l_ref)
        cnt_ref[...] = jnp.zeros_like(cnt_ref)
        sl_ref[...] = jnp.zeros_like(sl_ref)

    contract = (((1,), (1,)), ((), ()))  # contract the last axis of both operands

    # logits tile: temperature is already folded into the features (sqrt(1/T) per side).
    s = lax.dot_general(f_row_ref[...], f_col_ref[...], contract,
                        preferred_element_type=jnp.float32)

    # association tile rebuilt on the MXU (one-hot selects exactly one asso-row entry).
    if jnp.issubdtype(a_row_ref.dtype, jnp.integer):
        asso = lax.dot_general(a_row_ref[...], oh_col_ref[...], contract,
                               preferred_element_type=jnp.int32)
    else:
        asso = lax.dot_general(a_row_ref[...], oh_col_ref[...], contract,
                               preferred_element_type=jnp.float32)

    # Padded columns were built with an all-zero one-hot -> asso == 0 -> neutral, so the
    # only in-kernel mask is the global diagonal, and only on tiles that overlap it.
    def _diag_branch():
        row_ids = i * tm + lax.broadcasted_iota(jnp.int32, (tm, 1), 0)
        col_ids = j * tn + lax.broadcasted_iota(jnp.int32, (1, tn), 1)
        keep = row_ids != col_ids                      # thin iotas, broadcasted compare
        nonneutral = (asso != 0) & keep
        is_pos = (asso == 1) & keep
        s_nn = jnp.where(nonneutral, s, _NEG_BIG)
        p_cnt = jnp.sum(jnp.where(is_pos, 1.0, 0.0), axis=-1, keepdims=True)
        p_sl = jnp.sum(jnp.where(is_pos, s, 0.0), axis=-1, keepdims=True)
        return s_nn, p_cnt, p_sl

    def _plain_branch():
        nonneutral = asso != 0
        is_pos = asso == 1
        s_nn = jnp.where(nonneutral, s, _NEG_BIG)
        p_cnt = jnp.sum(jnp.where(is_pos, 1.0, 0.0), axis=-1, keepdims=True)
        p_sl = jnp.sum(jnp.where(is_pos, s, 0.0), axis=-1, keepdims=True)
        return s_nn, p_cnt, p_sl

    diag_overlap = (i * tm < (j + 1) * tn) & (j * tn < (i + 1) * tm)
    s_nn, p_cnt, p_sl = lax.cond(diag_overlap, _diag_branch, _plain_branch)

    # Online log-sum-exp over non-neutral entries only. Neutral entries are _NEG_BIG so
    # exp underflows to exactly 0 (same effect as the reference's -1e7 masked_fill).
    # All-neutral-prefix rows accumulate garbage that alpha=exp(_NEG_BIG - m_real)=0
    # rescales away, or that finalize discards (count == 0).
    m_prev = m_ref[...]
    m_new = jnp.maximum(m_prev, jnp.max(s_nn, axis=-1, keepdims=True))
    alpha = jnp.exp(m_prev - m_new)
    e = jnp.exp(s_nn - m_new)
    l_ref[...] = alpha * l_ref[...] + jnp.sum(e, axis=-1, keepdims=True)
    m_ref[...] = m_new
    cnt_ref[...] = cnt_ref[...] + p_cnt
    sl_ref[...] = sl_ref[...] + p_sl

    @pl.when(j == pl.num_programs(1) - 1)
    def _finalize():
        cnt = cnt_ref[...]
        has_pos = jnp.where(cnt > 0.0, 1.0, 0.0)
        inv_cnt = 1.0 / jnp.maximum(cnt, 1.0)
        lse = jnp.where(cnt > 0.0,
                        m_ref[...] + jnp.log(jnp.maximum(l_ref[...], 1e-37)),
                        0.0)
        # sum_j p_ij * log_q_ij = sum(pos*logits)/count - lse   (0 if no positives)
        row_val = sl_ref[...] * inv_cnt - has_pos * lse
        row_idx = i * tm + lax.broadcasted_iota(jnp.int32, (tm, 1), 0)
        out_ref[...] = jnp.where(row_idx < n_valid, row_val, 0.0)   # zero padded rows


def supcon_loss(features, label_ids, label_asso_mtx, temperature=0.1,
                batch_ids=None, block_rows=None, block_cols=None,
                matmul_dtype=jnp.bfloat16, asso_dtype=None):
    """SupContrLoss.forward(features, label_ids) with batch_ids=None.

    matmul_dtype: operand dtype for the logits matmul (bf16 recommended on the MXU;
    all elementwise/softmax math stays f32). asso_dtype: operand dtype for the
    association matmul (auto: int8 on v5*/v6*, bf16 otherwise; exact either way).
    """
    # TODO(synk): batch_ids is not None path (same-batch extra-neutral mask) not implemented.
    assert batch_ids is None
    n, d = features.shape
    num_labels = label_asso_mtx.shape[0]

    kind = _device_kind()
    two_core = any(t in kind for t in ("v7", "tpu7", "7x"))
    deep_col = "v5" in kind                      # v5*: HBM-bound -> deeper column buffering

    if block_rows is None:
        block_rows = 1024 if "v5" in kind else 512
    if block_cols is None:
        block_cols = 512
    if asso_dtype is None:
        asso_dtype = _pick_asso_dtype(kind)

    tm, tn, n_pad = _choose_tiles(n, block_rows, block_cols, two_core)
    d_pad = _round_up(d, 128)
    l_pad = _round_up(num_labels, 128)
    grid = (n_pad // tm, n_pad // tn)

    # Fold temperature into the features: sqrt(1/T) per operand, scaled in f32 before the
    # matmul-dtype cast, so the kernel never multiplies the (tm, tn) logits tile.
    scale = float(1.0 / temperature) ** 0.5
    feats = features.astype(jnp.float32) * scale
    feats = jnp.pad(feats, ((0, n_pad - n), (0, d_pad - d))).astype(matmul_dtype)

    ids = label_ids.astype(jnp.int32)
    # Snap association values to {-1, 0, +1}: the loss only distinguishes ==0 / ==1 /
    # other, so this is semantics preserving and exact in bf16/int8.
    a = label_asso_mtx.astype(jnp.float32)
    a = jnp.where(a == 1.0, 1.0, jnp.where(a == 0.0, 0.0, -1.0))
    a_rows = jnp.pad(a[ids, :], ((0, n_pad - n), (0, l_pad - num_labels))).astype(asso_dtype)
    # Padded rows get label -1 -> all-zero one-hot -> padded columns are neutral, so no
    # column-validity mask is needed inside the kernel.
    ids_pad = jnp.pad(ids, (0, n_pad - n), constant_values=-1)
    oh_cols = jax.nn.one_hot(ids_pad, l_pad, dtype=asso_dtype)

    kernel = functools.partial(_supcon_kernel, n_valid=n, tm=tm, tn=tn)

    # VMEM budget derived from the real footprint (per-generation cap).
    itm_f = jnp.dtype(matmul_dtype).itemsize
    itm_a = jnp.dtype(asso_dtype).itemsize
    col_bufs = 3 if deep_col else 2
    needed = (2 * tm * d_pad * itm_f             # feature row tile (double buffered)
              + col_bufs * tn * d_pad * itm_f    # feature column stream
              + 2 * tm * l_pad * itm_a           # association rows
              + col_bufs * tn * l_pad * itm_a    # one-hot column stream
              + 2 * tm * 128 * 4                 # output block (lane padded)
              + 4 * tm * 128 * 4                 # four (tm,1) f32 accumulators (lane padded)
              + 8 * tm * tn * 4)                 # in-flight (tm,tn) f32 intermediates
    cap = (40 << 20) if two_core else (100 << 20)
    vmem_limit = min(max(int(needed * 1.25), 32 << 20), cap)
    vmem_limit = max(vmem_limit, needed + (4 << 20))

    col_kwargs = {"pipeline_mode": pl.Buffered(3)} if deep_col else {}

    itemsize = itm_f
    bytes_accessed = int(n_pad * d_pad * itemsize * (1 + grid[0])   # row + column streams
                         + n_pad * l_pad * itm_a * (1 + grid[0])
                         + n_pad * 4)
    cost = pl.CostEstimate(flops=2 * n_pad * n_pad * (d_pad + l_pad),
                           transcendentals=n_pad * n_pad,
                           bytes_accessed=bytes_accessed)

    per_row = pl.pallas_call(
        kernel,
        out_shape=jax.ShapeDtypeStruct((n_pad, 1), jnp.float32),
        grid_spec=pltpu.PrefetchScalarGridSpec(
            num_scalar_prefetch=0,
            grid=grid,
            in_specs=[
                pl.BlockSpec((tm, d_pad), lambda i, j: (i, 0)),                # feature rows
                pl.BlockSpec((tn, d_pad), lambda i, j: (j, 0), **col_kwargs),  # feature cols
                pl.BlockSpec((tm, l_pad), lambda i, j: (i, 0)),                # asso rows
                pl.BlockSpec((tn, l_pad), lambda i, j: (j, 0), **col_kwargs),  # one-hot cols
            ],
            out_specs=pl.BlockSpec((tm, 1), lambda i, j: (i, 0)),
            scratch_shapes=[pltpu.VMEM((tm, 1), jnp.float32)] * 4,  # m, l, cnt, sum(pos*logit)
        ),
        compiler_params=pltpu.CompilerParams(
            dimension_semantics=("parallel", "arbitrary"),
            vmem_limit_bytes=vmem_limit),
        cost_estimate=cost,
    )(feats, feats, a_rows, oh_cols)

    return -jnp.sum(per_row) / n


def _reference_loss(features, label_ids, label_asso_mtx, temperature=0.1):
    """Pure-JAX mirror of the PyTorch forward (batch_ids=None)."""
    features = features.astype(jnp.float32)
    asso = label_asso_mtx[label_ids[:, None], label_ids[None, :]].astype(jnp.float32)
    n = asso.shape[0]
    asso = jnp.where(jnp.eye(n, dtype=bool), 0.0, asso)
    logits = jnp.matmul(features, features.T, precision="highest") / temperature
    logits = logits - jnp.max(logits, axis=-1, keepdims=True)
    logits = jnp.where(asso == 0.0, -10000000.0, logits)
    pos = (asso == 1.0).astype(jnp.float32)
    p = pos / jnp.maximum(pos.sum(-1, keepdims=True), 1.0)
    log_q = jax.nn.log_softmax(logits, axis=-1)
    return -jnp.mean(jnp.sum(p * log_q, axis=-1))


if __name__ == "__main__":
    key = jax.random.PRNGKey(0)
    k1, k2, k3, k4 = jax.random.split(key, 4)

    # --- small demo at the module's natural shapes (ncells=8, nfeats=32, 5 labels) ---
    N, D, L = 8, 32, 5
    feats = jax.random.normal(k1, (N, D), dtype=jnp.float32)
    feats = feats / jnp.linalg.norm(feats, axis=-1, keepdims=True)
    labels = jax.random.randint(k2, (N,), 0, L)
    ii = jnp.arange(L)
    asso_mtx = jnp.where(ii[:, None] == ii[None, :], 1.0,
                         jnp.where((ii[:, None] + ii[None, :]) % 3 == 0, 0.0, -1.0)
                         ).astype(jnp.float32)

    loss = supcon_loss(feats, labels, asso_mtx, temperature=0.1,
                       matmul_dtype=jnp.float32)          # f32 logits for a tight check
    loss = jax.block_until_ready(loss)
    ref = _reference_loss(feats, labels, asso_mtx, temperature=0.1)
    assert jnp.allclose(loss, ref, rtol=1e-2, atol=1e-2), (loss, ref)

    # --- multi-tile path: (3,3) grid, diagonal + off-diagonal tiles, padded N ---
    N2, D2, L2 = 300, 64, 7
    feats2 = jax.random.normal(k3, (N2, D2), dtype=jnp.float32)
    feats2 = feats2 / jnp.linalg.norm(feats2, axis=-1, keepdims=True)
    labels2 = jax.random.randint(k4, (N2,), 0, L2)
    jj = jnp.arange(L2)
    asso_mtx2 = jnp.where(jj[:, None] == jj[None, :], 1.0,
                          jnp.where((jj[:, None] - jj[None, :]) % 3 == 1, 0.0, -1.0)
                          ).astype(jnp.float32)
    ref2 = _reference_loss(feats2, labels2, asso_mtx2, temperature=0.1)

    loss2 = supcon_loss(feats2, labels2, asso_mtx2, temperature=0.1,
                        block_rows=128, block_cols=128, matmul_dtype=jnp.float32)
    loss2 = jax.block_until_ready(loss2)
    assert jnp.allclose(loss2, ref2, rtol=1e-2, atol=1e-2), (loss2, ref2)

    # --- production path: auto large tiles, bf16 logits, auto (int8/bf16) association ---
    loss3 = supcon_loss(feats2, labels2, asso_mtx2, temperature=0.1)
    loss3 = jax.block_until_ready(loss3)
    assert jnp.allclose(loss3, ref2, rtol=5e-2, atol=5e-2), (loss3, ref2)

    print("KERNEL_OK")
</pallas_src>

<mosaic_0001>
module attributes {stable_mosaic.version = 11 : i64} {
  func.func @_supcon_kernel(%arg0: i32, %arg1: i32, %arg2: memref<128x128xf32, #tpu.memory_space<vmem>>, %arg3: memref<128x128xf32, #tpu.memory_space<vmem>>, %arg4: memref<128x128xbf16, #tpu.memory_space<vmem>>, %arg5: memref<128x128xbf16, #tpu.memory_space<vmem>>, %arg6: memref<128x1xf32, #tpu.memory_space<vmem>>, %arg7: memref<128x1xf32, #tpu.memory_space<vmem>>, %arg8: memref<128x1xf32, #tpu.memory_space<vmem>>, %arg9: memref<128x1xf32, #tpu.memory_space<vmem>>, %arg10: memref<128x1xf32, #tpu.memory_space<vmem>>) attributes {dimension_semantics = [#tpu.dimension_semantics<parallel>, #tpu.dimension_semantics<arbitrary>], iteration_bounds = array<i64: 1, 1>, scalar_prefetch = 0 : i64, scratch_operands = 4 : i64, tpu.core_type = #tpu.core_type<tc>, window_params = [{transform_indices = @transform_0, window_bounds = array<i64: 128, 128>}, {transform_indices = @transform_1, window_bounds = array<i64: 128, 128>}, {transform_indices = @transform_2, window_bounds = array<i64: 128, 128>}, {transform_indices = @transform_3, window_bounds = array<i64: 128, 128>}, {transform_indices = @transform_4, window_bounds = array<i64: 128, 1>}]} {
    %c0_i32 = arith.constant 0 : i32
    %0 = arith.cmpi eq, %arg1, %c0_i32 : i32
    %1 = arith.extui %0 : i1 to i32
    %c0_i32_0 = arith.constant 0 : i32
    %2 = arith.cmpi ne, %1, %c0_i32_0 : i32
    scf.if %2 {
      %cst_34 = arith.constant -1.000000e+30 : f32
      %46 = vector.broadcast %cst_34 : f32 to vector<128x1xf32>
      %c0_35 = arith.constant 0 : index
      %c0_36 = arith.constant 0 : index
      %47 = vector.load %arg7[%c0_35, %c0_36] : memref<128x1xf32, #tpu.memory_space<vmem>>, vector<128x1xf32>
      tpu.vector_store %arg7[%c0_35, %c0_36], %46 {strides = array<i32>} : memref<128x1xf32, #tpu.memory_space<vmem>>, vector<128x1xf32>,
      %cst_37 = arith.constant 0.000000e+00 : f32
      %48 = vector.broadcast %cst_37 : f32 to vector<128x1xf32>
      %c0_38 = arith.constant 0 : index
      %c0_39 = arith.constant 0 : index
      %49 = vector.load %arg8[%c0_38, %c0_39] : memref<128x1xf32, #tpu.memory_space<vmem>>, vector<128x1xf32>
      tpu.vector_store %arg8[%c0_38, %c0_39], %48 {strides = array<i32>} : memref<128x1xf32, #tpu.memory_space<vmem>>, vector<128x1xf32>,
      %cst_40 = arith.constant 0.000000e+00 : f32
      %50 = vector.broadcast %cst_40 : f32 to vector<128x1xf32>
      %c0_41 = arith.constant 0 : index
      %c0_42 = arith.constant 0 : index
      %51 = vector.load %arg9[%c0_41, %c0_42] : memref<128x1xf32, #tpu.memory_space<vmem>>, vector<128x1xf32>
      tpu.vector_store %arg9[%c0_41, %c0_42], %50 {strides = array<i32>} : memref<128x1xf32, #tpu.memory_space<vmem>>, vector<128x1xf32>,
      %cst_43 = arith.constant 0.000000e+00 : f32
      %52 = vector.broadcast %cst_43 : f32 to vector<128x1xf32>
      %c0_44 = arith.constant 0 : index
      %c0_45 = arith.constant 0 : index
      %53 = vector.load %arg10[%c0_44, %c0_45] : memref<128x1xf32, #tpu.memory_space<vmem>>, vector<128x1xf32>
      tpu.vector_store %arg10[%c0_44, %c0_45], %52 {strides = array<i32>} : memref<128x1xf32, #tpu.memory_space<vmem>>, vector<128x1xf32>,
    } else {
    }
    %c0 = arith.constant 0 : index
    %c0_1 = arith.constant 0 : index
    %3 = vector.load %arg2[%c0, %c0_1] : memref<128x128xf32, #tpu.memory_space<vmem>>, vector<128x128xf32>
    %c0_2 = arith.constant 0 : index
    %c0_3 = arith.constant 0 : index
    %4 = vector.load %arg3[%c0_2, %c0_3] : memref<128x128xf32, #tpu.memory_space<vmem>>, vector<128x128xf32>
    %cst = arith.constant dense<0.000000e+00> : vector<128x128xf32>
    %5 = tpu.matmul %3, %4, %cst {dimension_numbers = #tpu.dot_dimension_numbers<[1], [1], [0], [0], [0, 0, 1, 0], [], []>} : vector<128x128xf32>, vector<128x128xf32>, vector<128x128xf32> -> vector<128x128xf32>
    %c0_4 = arith.constant 0 : index
    %c0_5 = arith.constant 0 : index
    %6 = vector.load %arg4[%c0_4, %c0_5] : memref<128x128xbf16, #tpu.memory_space<vmem>>, vector<128x128xbf16>
    %c0_6 = arith.constant 0 : index
    %c0_7 = arith.constant 0 : index
    %7 = vector.load %arg5[%c0_6, %c0_7] : memref<128x128xbf16, #tpu.memory_space<vmem>>, vector<128x128xbf16>
    %cst_8 = arith.constant dense<0.000000e+00> : vector<128x128xf32>
    %8 = tpu.matmul %6, %7, %cst_8 {dimension_numbers = #tpu.dot_dimension_numbers<[1], [1], [0], [0], [0, 0, 1, 0], [], []>} : vector<128x128xbf16>, vector<128x128xbf16>, vector<128x128xf32> -> vector<128x128xf32>
    %c128_i32 = arith.constant 128 : i32
    %9 = arith.muli %arg0, %c128_i32 : i32
    %c1_i32 = arith.constant 1 : i32
    %10 = arith.addi %arg1, %c1_i32 : i32
    %c128_i32_9 = arith.constant 128 : i32
    %11 = arith.muli %10, %c128_i32_9 : i32
    %12 = arith.cmpi slt, %9, %11 : i32
    %c128_i32_10 = arith.constant 128 : i32
    %13 = arith.muli %arg1, %c128_i32_10 : i32
    %c1_i32_11 = arith.constant 1 : i32
    %14 = arith.addi %arg0, %c1_i32_11 : i32
    %c128_i32_12 = arith.constant 128 : i32
    %15 = arith.muli %14, %c128_i32_12 : i32
    %16 = arith.cmpi slt, %13, %15 : i32
    %17 = arith.andi %12, %16 : i1
    %18 = arith.extui %17 : i1 to i32
    %c0_i32_13 = arith.constant 0 : i32
    %19 = arith.cmpi ne, %18, %c0_i32_13 : i32
    %20:3 = scf.if %19 -> (vector<128x128xf32>, vector<128x1xf32>, vector<128x1xf32>) {
      %c128_i32_34 = arith.constant 128 : i32
      %46 = arith.muli %arg0, %c128_i32_34 : i32
      %47 = tpu.iota {dimensions = array<i32: 0>} : vector<128x1xi32>
      %48 = vector.broadcast %46 : i32 to vector<128x1xi32>
      %49 = arith.addi %48, %47 : vector<128x1xi32>
      %c128_i32_35 = arith.constant 128 : i32
      %50 = arith.muli %arg1, %c128_i32_35 : i32
      %51 = tpu.iota {dimensions = array<i32: 1>} : vector<1x128xi32>
      %52 = vector.broadcast %50 : i32 to vector<1x128xi32>
      %53 = arith.addi %52, %51 : vector<1x128xi32>
      %54 = vector.broadcast %49 : vector<128x1xi32> to vector<128x128xi32>
      %55 = vector.broadcast %53 : vector<1x128xi32> to vector<128x128xi32>
      %56 = arith.cmpi ne, %54, %55 : vector<128x128xi32>
      %cst_36 = arith.constant 0.000000e+00 : f32
      %57 = vector.broadcast %cst_36 : f32 to vector<128x128xf32>
      %58 = arith.cmpf one, %8, %57 : vector<128x128xf32>
      %59 = arith.andi %58, %56 : vector<128x128xi1>
      %cst_37 = arith.constant 1.000000e+00 : f32
      %60 = vector.broadcast %cst_37 : f32 to vector<128x128xf32>
      %61 = arith.cmpf oeq, %8, %60 : vector<128x128xf32>
      %62 = arith.andi %61, %56 : vector<128x128xi1>
      %cst_38 = arith.constant -1.000000e+30 : f32
      %63 = vector.broadcast %cst_38 : f32 to vector<128x128xf32>
      %64 = arith.select %59, %5, %63 : vector<128x128xi1>, vector<128x128xf32>
      %cst_39 = arith.constant 1.000000e+00 : f32
      %cst_40 = arith.constant 0.000000e+00 : f32
      %65 = vector.broadcast %cst_39 : f32 to vector<128x128xf32>
      %66 = vector.broadcast %cst_40 : f32 to vector<128x128xf32>
      %67 = arith.select %62, %65, %66 : vector<128x128xi1>, vector<128x128xf32>
      %cst_41 = arith.constant dense<0.000000e+00> : vector<128xf32>
      %68 = vector.multi_reduction <add>, %67, %cst_41 [1] : vector<128x128xf32> to vector<128xf32>
      %69 = vector.shape_cast %68 : vector<128xf32> to vector<128x1xf32>
      %cst_42 = arith.constant 0.000000e+00 : f32
      %70 = vector.broadcast %cst_42 : f32 to vector<128x128xf32>
      %71 = arith.select %62, %5, %70 : vector<128x128xi1>, vector<128x128xf32>
      %cst_43 = arith.constant dense<0.000000e+00> : vector<128xf32>
      %72 = vector.multi_reduction <add>, %71, %cst_43 [1] : vector<128x128xf32> to vector<128xf32>
      %73 = vector.shape_cast %72 : vector<128xf32> to vector<128x1xf32>
      scf.yield %64, %69, %73 : vector<128x128xf32>, vector<128x1xf32>, vector<128x1xf32>
    } else {
      %cst_34 = arith.constant 0.000000e+00 : f32
      %46 = vector.broadcast %cst_34 : f32 to vector<128x128xf32>
      %47 = arith.cmpf one, %8, %46 : vector<128x128xf32>
      %cst_35 = arith.constant 1.000000e+00 : f32
      %48 = vector.broadcast %cst_35 : f32 to vector<128x128xf32>
      %49 = arith.cmpf oeq, %8, %48 : vector<128x128xf32>
      %cst_36 = arith.constant -1.000000e+30 : f32
      %50 = vector.broadcast %cst_36 : f32 to vector<128x128xf32>
      %51 = arith.select %47, %5, %50 : vector<128x128xi1>, vector<128x128xf32>
      %cst_37 = arith.constant 1.000000e+00 : f32
      %cst_38 = arith.constant 0.000000e+00 : f32
      %52 = vector.broadcast %cst_37 : f32 to vector<128x128xf32>
      %53 = vector.broadcast %cst_38 : f32 to vector<128x128xf32>
      %54 = arith.select %49, %52, %53 : vector<128x128xi1>, vector<128x128xf32>
      %cst_39 = arith.constant dense<0.000000e+00> : vector<128xf32>
      %55 = vector.multi_reduction <add>, %54, %cst_39 [1] : vector<128x128xf32> to vector<128xf32>
      %56 = vector.shape_cast %55 : vector<128xf32> to vector<128x1xf32>
      %cst_40 = arith.constant 0.000000e+00 : f32
      %57 = vector.broadcast %cst_40 : f32 to vector<128x128xf32>
      %58 = arith.select %49, %5, %57 : vector<128x128xi1>, vector<128x128xf32>
      %cst_41 = arith.constant dense<0.000000e+00> : vector<128xf32>
      %59 = vector.multi_reduction <add>, %58, %cst_41 [1] : vector<128x128xf32> to vector<128xf32>
      %60 = vector.shape_cast %59 : vector<128xf32> to vector<128x1xf32>
      scf.yield %51, %56, %60 : vector<128x128xf32>, vector<128x1xf32>, vector<128x1xf32>
    }
    %c0_14 = arith.constant 0 : index
    %c0_15 = arith.constant 0 : index
    %21 = vector.load %arg7[%c0_14, %c0_15] : memref<128x1xf32, #tpu.memory_space<vmem>>, vector<128x1xf32>
    %cst_16 = arith.constant dense<0xFF800000> : vector<128xf32>
    %22 = vector.multi_reduction <maximumf>, %20#0, %cst_16 [1] : vector<128x128xf32> to vector<128xf32>
    %23 = vector.shape_cast %22 : vector<128xf32> to vector<128x1xf32>
    %24 = arith.maximumf %21, %23 : vector<128x1xf32>
    %25 = arith.subf %21, %24 : vector<128x1xf32>
    %26 = math.exp %25 : vector<128x1xf32>
    %27 = vector.broadcast %24 : vector<128x1xf32> to vector<128x128xf32>
    %28 = arith.subf %20#0, %27 : vector<128x128xf32>
    %29 = math.exp %28 : vector<128x128xf32>
    %c0_17 = arith.constant 0 : index
    %c0_18 = arith.constant 0 : index
    %30 = vector.load %arg8[%c0_17, %c0_18] : memref<128x1xf32, #tpu.memory_space<vmem>>, vector<128x1xf32>
    %31 = arith.mulf %26, %30 : vector<128x1xf32>
    %cst_19 = arith.constant dense<0.000000e+00> : vector<128xf32>
    %32 = vector.multi_reduction <add>, %29, %cst_19 [1] : vector<128x128xf32> to vector<128xf32>
    %33 = vector.shape_cast %32 : vector<128xf32> to vector<128x1xf32>
    %34 = arith.addf %31, %33 : vector<128x1xf32>
    %c0_20 = arith.constant 0 : index
    %c0_21 = arith.constant 0 : index
    %35 = vector.load %arg8[%c0_20, %c0_21] : memref<128x1xf32, #tpu.memory_space<vmem>>, vector<128x1xf32>
    tpu.vector_store %arg8[%c0_20, %c0_21], %34 {strides = array<i32>} : memref<128x1xf32, #tpu.memory_space<vmem>>, vector<128x1xf32>,
    %c0_22 = arith.constant 0 : index
    %c0_23 = arith.constant 0 : index
    %36 = vector.load %arg7[%c0_22, %c0_23] : memref<128x1xf32, #tpu.memory_space<vmem>>, vector<128x1xf32>
    tpu.vector_store %arg7[%c0_22, %c0_23], %24 {strides = array<i32>} : memref<128x1xf32, #tpu.memory_space<vmem>>, vector<128x1xf32>,
    %c0_24 = arith.constant 0 : index
    %c0_25 = arith.constant 0 : index
    %37 = vector.load %arg9[%c0_24, %c0_25] : memref<128x1xf32, #tpu.memory_space<vmem>>, vector<128x1xf32>
    %38 = arith.addf %37, %20#1 : vector<128x1xf32>
    %c0_26 = arith.constant 0 : index
    %c0_27 = arith.constant 0 : index
    %39 = vector.load %arg9[%c0_26, %c0_27] : memref<128x1xf32, #tpu.memory_space<vmem>>, vector<128x1xf32>
    tpu.vector_store %arg9[%c0_26, %c0_27], %38 {strides = array<i32>} : memref<128x1xf32, #tpu.memory_space<vmem>>, vector<128x1xf32>,
    %c0_28 = arith.constant 0 : index
    %c0_29 = arith.constant 0 : index
    %40 = vector.load %arg10[%c0_28, %c0_29] : memref<128x1xf32, #tpu.memory_space<vmem>>, vector<128x1xf32>
    %41 = arith.addf %40, %20#2 : vector<128x1xf32>
    %c0_30 = arith.constant 0 : index
    %c0_31 = arith.constant 0 : index
    %42 = vector.load %arg10[%c0_30, %c0_31] : memref<128x1xf32, #tpu.memory_space<vmem>>, vector<128x1xf32>
    tpu.vector_store %arg10[%c0_30, %c0_31], %41 {strides = array<i32>} : memref<128x1xf32, #tpu.memory_space<vmem>>, vector<128x1xf32>,
    %c0_i32_32 = arith.constant 0 : i32
    %43 = arith.cmpi eq, %arg1, %c0_i32_32 : i32
    %44 = arith.extui %43 : i1 to i32
    %c0_i32_33 = arith.constant 0 : i32
    %45 = arith.cmpi ne, %44, %c0_i32_33 : i32
    scf.if %45 {
      %c0_34 = arith.constant 0 : index
      %c0_35 = arith.constant 0 : index
      %46 = vector.load %arg9[%c0_34, %c0_35] : memref<128x1xf32, #tpu.memory_space<vmem>>, vector<128x1xf32>
      %cst_36 = arith.constant 0.000000e+00 : f32
      %47 = vector.broadcast %cst_36 : f32 to vector<128x1xf32>
      %48 = arith.cmpf ogt, %46, %47 : vector<128x1xf32>
      %cst_37 = arith.constant 1.000000e+00 : f32
      %cst_38 = arith.constant 0.000000e+00 : f32
      %49 = vector.broadcast %cst_37 : f32 to vector<128x1xf32>
      %50 = vector.broadcast %cst_38 : f32 to vector<128x1xf32>
      %51 = arith.select %48, %49, %50 : vector<128x1xi1>, vector<128x1xf32>
      %cst_39 = arith.constant 1.000000e+00 : f32
      %52 = vector.broadcast %cst_39 : f32 to vector<128x1xf32>
      %53 = arith.maximumf %46, %52 : vector<128x1xf32>
      %cst_40 = arith.constant 1.000000e+00 : f32
      %54 = vector.broadcast %cst_40 : f32 to vector<128x1xf32>
      %55 = arith.divf %54, %53 : vector<128x1xf32>
      %cst_41 = arith.constant 0.000000e+00 : f32
      %56 = vector.broadcast %cst_41 : f32 to vector<128x1xf32>
      %57 = arith.cmpf ogt, %46, %56 : vector<128x1xf32>
      %c0_42 = arith.constant 0 : index
      %c0_43 = arith.constant 0 : index
      %58 = vector.load %arg7[%c0_42, %c0_43] : memref<128x1xf32, #tpu.memory_space<vmem>>, vector<128x1xf32>
      %c0_44 = arith.constant 0 : index
      %c0_45 = arith.constant 0 : index
      %59 = vector.load %arg8[%c0_44, %c0_45] : memref<128x1xf32, #tpu.memory_space<vmem>>, vector<128x1xf32>
      %cst_46 = arith.constant 9.99999991E-38 : f32
      %60 = vector.broadcast %cst_46 : f32 to vector<128x1xf32>
      %61 = arith.maximumf %59, %60 : vector<128x1xf32>
      %62 = math.log %61 : vector<128x1xf32>
      %63 = arith.addf %58, %62 : vector<128x1xf32>
      %cst_47 = arith.constant 0.000000e+00 : f32
      %64 = vector.broadcast %cst_47 : f32 to vector<128x1xf32>
      %65 = arith.select %57, %63, %64 : vector<128x1xi1>, vector<128x1xf32>
      %c0_48 = arith.constant 0 : index
      %c0_49 = arith.constant 0 : index
      %66 = vector.load %arg10[%c0_48, %c0_49] : memref<128x1xf32, #tpu.memory_space<vmem>>, vector<128x1xf32>
      %67 = arith.mulf %66, %55 : vector<128x1xf32>
      %68 = arith.mulf %51, %65 : vector<128x1xf32>
      %69 = arith.subf %67, %68 : vector<128x1xf32>
      %c128_i32_50 = arith.constant 128 : i32
      %70 = arith.muli %arg0, %c128_i32_50 : i32
      %71 = tpu.iota {dimensions = array<i32: 0>} : vector<128x1xi32>
      %72 = vector.broadcast %70 : i32 to vector<128x1xi32>
      %73 = arith.addi %72, %71 : vector<128x1xi32>
      %c8_i32 = arith.constant 8 : i32
      %74 = vector.broadcast %c8_i32 : i32 to vector<128x1xi32>
      %75 = arith.cmpi slt, %73, %74 : vector<128x1xi32>
      %cst_51 = arith.constant 0.000000e+00 : f32
      %76 = vector.broadcast %cst_51 : f32 to vector<128x1xf32>
      %77 = arith.select %75, %69, %76 : vector<128x1xi1>, vector<128x1xf32>
      %c0_52 = arith.constant 0 : index
      %c0_53 = arith.constant 0 : index
      %78 = vector.load %arg6[%c0_52, %c0_53] : memref<128x1xf32, #tpu.memory_space<vmem>>, vector<128x1xf32>
      tpu.vector_store %arg6[%c0_52, %c0_53], %77 {strides = array<i32>} : memref<128x1xf32, #tpu.memory_space<vmem>>, vector<128x1xf32>,
    } else {
    }
    return
  }
  func.func @transform_0(%arg0: i32, %arg1: i32) -> (i32, i32) {
    %c0_i32 = arith.constant 0 : i32
    %c0_i32_0 = arith.constant 0 : i32
    return %arg0, %c0_i32 : i32, i32
  }
  func.func @transform_1(%arg0: i32, %arg1: i32) -> (i32, i32) {
    %c0_i32 = arith.constant 0 : i32
    %c0_i32_0 = arith.constant 0 : i32
    return %arg1, %c0_i32 : i32, i32
  }
  func.func @transform_2(%arg0: i32, %arg1: i32) -> (i32, i32) {
    %c0_i32 = arith.constant 0 : i32
    %c0_i32_0 = arith.constant 0 : i32
    return %arg0, %c0_i32 : i32, i32
  }
  func.func @transform_3(%arg0: i32, %arg1: i32) -> (i32, i32) {
    %c0_i32 = arith.constant 0 : i32
    %c0_i32_0 = arith.constant 0 : i32
    return %arg1, %c0_i32 : i32, i32
  }
  func.func @transform_4(%arg0: i32, %arg1: i32) -> (i32, i32) {
    %c0_i32 = arith.constant 0 : i32
    %c0_i32_0 = arith.constant 0 : i32
    return %arg0, %c0_i32 : i32, i32
  }
}

</mosaic_0001>

<bundles_post_ra>
// kernel: tpu_custom_call.1
= control target key start
LH: loop header
LB: loop body
LE: loop exit
PB: predicated region body
PF: predicated region fallthrough
CT: control target
= control target key end

     0   :  { %9 = vsyncpa [#allocation7], 0  ;;  %s2933_s0 = inlined_call_operand.hbm [shape: f32[128,128], index: 0, kind: input, shape index: {}]   ;;  %s2934_s1 = inlined_call_operand.hbm [shape: f32[128,128], index: 1, kind: input, shape index: {}]   ;;  %s2935_s2 = inlined_call_operand.hbm [shape: bf16[128,128], index: 2, kind: input, shape index: {}]   ;;  %s2936_s3 = inlined_call_operand.hbm [shape: bf16[128,128], index: 3, kind: input, shape index: {}]   ;;  %s2937_s4 = inlined_call_operand.vmem [shape: f32[128,1], index: 4, kind: output, shape index: {}]  }
   0x1   :  { %10 = vsyncpa [#allocation9], 0 }
   0x2   :  { %11 = vsyncpa [#allocation12], 0  ;;  %s29_s17 = sshll.u32 %s2934_s1, 4  ;;  %s2217_s18 = smov [#allocation8]   ;;  %s30_s17 = int_to_ptr.hbm [resolvable:$true] %s29_s17 }
   0x3   :  { %s31_s19 = sshll.u32 %s2217_s18, 4  ;;  %s16_s22 = sshll.u32 %s2933_s0, 4  ;;  %s32_s19 = int_to_ptr.vmem [resolvable:$true] %s31_s19  ;;  %s17_s22 = int_to_ptr.hbm [resolvable:$true] %s16_s22 }
   0x4   :  { %s2218_s23 = smov 128   ;;  %s2219_s24 = smov 8  }
   0x5   :  { %37 = dma.hbm_to_vmem [thread:$0]  %s30_s17, 2048, %s32_s19, [#allocation9], %s2218_s23, %s2218_s23, %s2219_s24  }
   0x6   :  { %s2220_s25 = smov [#allocation6]   ;;  %s42_s29 = sshll.u32 %s2935_s2, 4  ;;  %s43_s29 = int_to_ptr.hbm [resolvable:$true] %s42_s29 }
   0x7   :  { %s18_s26 = sshll.u32 %s2220_s25, 4  ;;  %s2221_s1 = smov [#allocation10]   ;;  %s19_s26 = int_to_ptr.vmem [resolvable:$true] %s18_s26 }
   0x8   :  { %24 = dma.hbm_to_vmem [thread:$0]  %s17_s22, 2048, %s19_s26, [#allocation7], %s2218_s23, %s2218_s23, %s2219_s24  }
   0x9   :  { %s44_s30 = sshll.u32 %s2221_s1, 4  ;;  %s55_s0 = sshll.u32 %s2936_s3, 4  ;;  %s45_s30 = int_to_ptr.vmem [resolvable:$true] %s44_s30  ;;  %s56_s0 = int_to_ptr.hbm [resolvable:$true] %s55_s0 }
   0xa   :  { %s2222_s7 = smov 64   ;;  %s2223_s8 = smov 4  }
   0xb   :  { %50 = dma.hbm_to_vmem [thread:$0]  %s43_s29, 1024, %s45_s30, [#allocation9], %s2222_s7, %s2222_s7, %s2223_s8  }
   0xc   :  { %s2224_s9 = smov [#allocation11]  }
   0xd   :  { %s57_s10 = sshll.u32 %s2224_s9, 4  ;;  %s58_s10 = int_to_ptr.vmem [resolvable:$true] %s57_s10 }
   0xe   :  { %63 = dma.hbm_to_vmem [thread:$0]  %s56_s0, 1024, %s58_s10, [#allocation12], %s2222_s7, %s2222_s7, %s2223_s8  }
   0xf   :  { %2211 = dma.done.wait [#allocation7], 2048  }
  0x10   :  { %2212 = vsyncadd [#allocation7], 4294965248 }
  0x11   :  { %2213 = dma.done.wait [#allocation9], 3072  }
  0x12   :  { %2214 = vsyncadd [#allocation9], 4294964224 }
  0x13   :  { %2215 = dma.done.wait [#allocation12], 1024  }
  0x14   :  { %2216 = vsyncadd [#allocation12], 4294966272  ;;  %vm84_vm0 = vcmask 7168   ;;  %v2938_v0 = vmov 0.0   ;;  %v2008_v1 = vld [vmem:[#allocation11 + $0x38] sm:$0xff]  ;;  %v179_v3 = vld [vmem:[#allocation8 + $0x70] sm:$0xff]  ;;  %v435_v49 = vlaneseq }
  0x15   :  { %1907 = vst.msk [vmem:[%s2937_s4 + $0x8] sm:$0xff] %vm84_vm0, %v2938_v0  ;;  %v180_v2 = vld [vmem:[#allocation8 + $0x78] sm:$0xff]  ;;  %374 = vmatpush.bf16.xpose.msra.mxu1 %v2008_v1  ;;  %2025 = vmatpush.bf16.xpose.msra.mxu3 %v2008_v1  ;;  %v2007_v4 = vld [vmem:[#allocation11 + $0x30] sm:$0xff]  ;;  %v178_v5 = vld [vmem:[#allocation8 + $0x68] sm:$0xff] }
  0x16   :  { %1908 = vst.msk [vmem:[%s2937_s4 + $0x10] sm:$0xff] %vm84_vm0, %v2938_v0  ;;  %181 = vmatpush.xpose.msra.mxu0 %v180_v2  ;;  %2009 = vmatpush.xpose.msra.mxu2 %v180_v2  ;;  %v177_v6 = vld [vmem:[#allocation8 + $0x60] sm:$0xff]  ;;  %v2006_v7 = vld [vmem:[#allocation11 + $0x28] sm:$0xff]  ;;  %v176_v8 = vld [vmem:[#allocation8 + $0x58] sm:$0xff]  ;;  %v2436_v50 = vshrl.u32 %v435_v49, 7  ;;  %v2438_v51 = vand.u32 127, %v435_v49 }
  0x17   :  { %1909 = vst.msk [vmem:[%s2937_s4 + $0x18] sm:$0xff] %vm84_vm0, %v2938_v0  ;;  %v175_v9 = vld [vmem:[#allocation8 + $0x50] sm:$0xff]  ;;  %v2005_v10 = vld [vmem:[#allocation11 + $0x20] sm:$0xff]  ;;  %v174_v11 = vld [vmem:[#allocation8 + $0x48] sm:$0xff] }
  0x18   :  { %1910 = vst.msk [vmem:[%s2937_s4 + $0x20] sm:$0xff] %vm84_vm0, %v2938_v0  ;;  %v173_v12 = vld [vmem:[#allocation8 + $0x40] sm:$0xff]  ;;  %v2004_v13 = vld [vmem:[#allocation11 + $0x18] sm:$0xff]  ;;  %v171_v15 = vld [vmem:[#allocation8 + $0x30] sm:$0xff]  ;;  %vm473_vm1 = vcmp.ne.s32.totalorder %v2436_v50, %v2438_v51  ;;  %v444_v54 = vadd.s32 64, %v2436_v50  ;;  %v437_v61 = vadd.s32 8, %v2436_v50 }
  0x19   :  { %1911 = vst.msk [vmem:[%s2937_s4 + $0x28] sm:$0xff] %vm84_vm0, %v2938_v0  ;;  %v172_v14 = vld [vmem:[#allocation8 + $0x38] sm:$0xff]  ;;  %v2003_v16 = vld [vmem:[#allocation11 + $0x10] sm:$0xff]  ;;  %v170_v17 = vld [vmem:[#allocation8 + $0x28] sm:$0xff]  ;;  %v445_v63 = vadd.s32 72, %v2436_v50 }
  0x1a   :  { %1912 = vst.msk [vmem:[%s2937_s4 + $0x30] sm:$0xff] %vm84_vm0, %v2938_v0  ;;  %182 = vmatpush.xpose.msra.mxu0 %v179_v3  ;;  %2010 = vmatpush.xpose.msra.mxu2 %v179_v3  ;;  %v169_v18 = vld [vmem:[#allocation8 + $0x20] sm:$0xff]  ;;  %v2002_v19 = vld [vmem:[#allocation11 + $0x8] sm:$0xff]  ;;  %v168_v20 = vld [vmem:[#allocation8 + $0x18] sm:$0xff]  ;;  %vm481_vm6 = vcmp.ne.s32.totalorder %v444_v54, %v2438_v51  ;;  %vm474_vm12 = vcmp.ne.s32.totalorder %v437_v61, %v2438_v51 }
  0x1b   :  { %1913 = vst.msk [vmem:[%s2937_s4 + $0x38] sm:$0xff] %vm84_vm0, %v2938_v0  ;;  %v167_v21 = vld [vmem:[#allocation8 + $0x10] sm:$0xff]  ;;  %v2001_v22 = vld [vmem:[#allocation11] sm:$0xff]  ;;  %v166_v23 = vld [vmem:[#allocation8 + $0x8] sm:$0xff]  ;;  %vm482_vm13 = vcmp.ne.s32.totalorder %v445_v63, %v2438_v51 }
  0x1c   :  { %1914 = vst.msk [vmem:[%s2937_s4 + $0x40] sm:$0xff] %vm84_vm0, %v2938_v0  ;;  %v165_v24 = vld [vmem:[#allocation8] sm:$0xff]  ;;  %v150_v29 = vld [vmem:[#allocation6 + $0x8] sm:$0xff]  ;;  %v159_v32 = vld [vmem:[#allocation6 + $0x50] sm:$0xff] }
  0x1d   :  { %1915 = vst.msk [vmem:[%s2937_s4 + $0x48] sm:$0xff] %vm84_vm0, %v2938_v0  ;;  %375 = vmatpush.bf16.xpose.msra.mxu1 %v2007_v4  ;;  %2026 = vmatpush.bf16.xpose.msra.mxu3 %v2007_v4  ;;  %v1993_v25 = vld [vmem:[#allocation10] sm:$0xff]  ;;  %v158_v30 = vld [vmem:[#allocation6 + $0x48] sm:$0xff]  ;;  %v151_v34 = vld [vmem:[#allocation6 + $0x10] sm:$0xff]  ;;  %v438_v4 = vadd.s32 16, %v2436_v50 }
  0x1e   :  { %1916 = vst.msk [vmem:[%s2937_s4 + $0x50] sm:$0xff] %vm84_vm0, %v2938_v0  ;;  %183 = vmatpush.xpose.msra.mxu0 %v178_v5  ;;  %2011 = vmatpush.xpose.msra.mxu2 %v178_v5  ;;  %v1997_v26 = vld [vmem:[#allocation10 + $0x20] sm:$0xff]  ;;  %v1998_v31 = vld [vmem:[#allocation10 + $0x28] sm:$0xff]  ;;  %v160_v35 = vld [vmem:[#allocation6 + $0x58] sm:$0xff] }
  0x1f   :  { %1917 = vst.msk [vmem:[%s2937_s4 + $0x58] sm:$0xff] %vm84_vm0, %v2938_v0  ;;  %v149_v27 = vld [vmem:[#allocation6] sm:$0xff]  ;;  %v1994_v33 = vld [vmem:[#allocation10 + $0x8] sm:$0xff]  ;;  %v152_v36 = vld [vmem:[#allocation6 + $0x18] sm:$0xff] }
  0x20   :  { %1918 = vst.msk [vmem:[%s2937_s4 + $0x60] sm:$0xff] %vm84_vm0, %v2938_v0  ;;  %v157_v28 = vld [vmem:[#allocation6 + $0x40] sm:$0xff]  ;;  %v1995_v37 = vld [vmem:[#allocation10 + $0x10] sm:$0xff]  ;;  %v154_v41 = vld [vmem:[#allocation6 + $0x28] sm:$0xff] }
  0x21   :  { %1919 = vst.msk [vmem:[%s2937_s4 + $0x68] sm:$0xff] %vm84_vm0, %v2938_v0  ;;  %v153_v38 = vld [vmem:[#allocation6 + $0x20] sm:$0xff]  ;;  %v1999_v39 = vld [vmem:[#allocation10 + $0x30] sm:$0xff]  ;;  %v162_v42 = vld [vmem:[#allocation6 + $0x68] sm:$0xff] }
  0x22   :  { %1920 = vst.msk [vmem:[%s2937_s4 + $0x70] sm:$0xff] %vm84_vm0, %v2938_v0  ;;  %184 = vmatpush.xpose.msra.mxu0 %v177_v6  ;;  %2012 = vmatpush.xpose.msra.mxu2 %v177_v6  ;;  %v161_v40 = vld [vmem:[#allocation6 + $0x60] sm:$0xff]  ;;  %v1996_v43 = vld [vmem:[#allocation10 + $0x18] sm:$0xff]  ;;  %v155_v44 = vld [vmem:[#allocation6 + $0x30] sm:$0xff] }
  0x23   :  { %1921 = vst.msk [vmem:[%s2937_s4 + $0x78] sm:$0xff] %vm84_vm0, %v2938_v0  ;;  %v2000_v45 = vld [vmem:[#allocation10 + $0x38] sm:$0xff]  ;;  %v163_v46 = vld [vmem:[#allocation6 + $0x70] sm:$0xff] }
  0x24   :  { %101 = vst.msk [vmem:[#allocation3] sm:$0xff] %vm84_vm0, %v2938_v0  ;;  %v156_v47 = vld [vmem:[#allocation6 + $0x38] sm:$0xff] }
  0x25   :  { %102 = vst.msk [vmem:[#allocation3 + $0x8] sm:$0xff] %vm84_vm0, %v2938_v0  ;;  %376 = vmatpush.bf16.xpose.msra.mxu1 %v2006_v7  ;;  %2027 = vmatpush.bf16.xpose.msra.mxu3 %v2006_v7  ;;  %v164_v48 = vld [vmem:[#allocation6 + $0x78] sm:$0xff] }
  0x26   :  { %103 = vst.msk [vmem:[#allocation3 + $0x10] sm:$0xff] %vm84_vm0, %v2938_v0  ;;  %185 = vmatpush.xpose.msra.mxu0 %v176_v8  ;;  %2013 = vmatpush.xpose.msra.mxu2 %v176_v8 }
  0x27   :  { %104 = vst.msk [vmem:[#allocation3 + $0x18] sm:$0xff] %vm84_vm0, %v2938_v0 }
  0x28   :  { %105 = vst.msk [vmem:[#allocation3 + $0x20] sm:$0xff] %vm84_vm0, %v2938_v0 }
  0x29   :  { %106 = vst.msk [vmem:[#allocation3 + $0x28] sm:$0xff] %vm84_vm0, %v2938_v0 }
  0x2a   :  { %107 = vst.msk [vmem:[#allocation3 + $0x30] sm:$0xff] %vm84_vm0, %v2938_v0  ;;  %186 = vmatpush.xpose.msra.mxu0 %v175_v9  ;;  %2014 = vmatpush.xpose.msra.mxu2 %v175_v9 }
  0x2b   :  { %108 = vst.msk [vmem:[#allocation3 + $0x38] sm:$0xff] %vm84_vm0, %v2938_v0 }
  0x2c   :  { %109 = vst.msk [vmem:[#allocation3 + $0x40] sm:$0xff] %vm84_vm0, %v2938_v0 }
  0x2d   :  { %110 = vst.msk [vmem:[#allocation3 + $0x48] sm:$0xff] %vm84_vm0, %v2938_v0  ;;  %377 = vmatpush.bf16.xpose.msra.mxu1 %v2005_v10  ;;  %2028 = vmatpush.bf16.xpose.msra.mxu3 %v2005_v10 }
  0x2e   :  { %111 = vst.msk [vmem:[#allocation3 + $0x50] sm:$0xff] %vm84_vm0, %v2938_v0  ;;  %187 = vmatpush.xpose.msra.mxu0 %v174_v11  ;;  %2015 = vmatpush.xpose.msra.mxu2 %v174_v11 }
  0x2f   :  { %112 = vst.msk [vmem:[#allocation3 + $0x58] sm:$0xff] %vm84_vm0, %v2938_v0 }
  0x30   :  { %113 = vst.msk [vmem:[#allocation3 + $0x60] sm:$0xff] %vm84_vm0, %v2938_v0 }
  0x31   :  { %114 = vst.msk [vmem:[#allocation3 + $0x68] sm:$0xff] %vm84_vm0, %v2938_v0 }
  0x32   :  { %115 = vst.msk [vmem:[#allocation3 + $0x70] sm:$0xff] %vm84_vm0, %v2938_v0  ;;  %188 = vmatpush.xpose.msra.mxu0 %v173_v12  ;;  %2016 = vmatpush.xpose.msra.mxu2 %v173_v12 }
  0x33   :  { %116 = vst.msk [vmem:[#allocation3 + $0x78] sm:$0xff] %vm84_vm0, %v2938_v0 }
  0x34   :  { %117 = vst.msk [vmem:[#allocation4] sm:$0xff] %vm84_vm0, %v2938_v0 }
  0x35   :  { %118 = vst.msk [vmem:[#allocation4 + $0x8] sm:$0xff] %vm84_vm0, %v2938_v0  ;;  %378 = vmatpush.bf16.xpose.msra.mxu1 %v2004_v13  ;;  %2029 = vmatpush.bf16.xpose.msra.mxu3 %v2004_v13  ;;  %v446_v13 = vadd.s32 80, %v2436_v50 }
  0x36   :  { %119 = vst.msk [vmem:[#allocation4 + $0x10] sm:$0xff] %vm84_vm0, %v2938_v0  ;;  %189 = vmatpush.xpose.msra.mxu0 %v172_v14  ;;  %2017 = vmatpush.xpose.msra.mxu2 %v172_v14 }
  0x37   :  { %120 = vst.msk [vmem:[#allocation4 + $0x18] sm:$0xff] %vm84_vm0, %v2938_v0 }
  0x38   :  { %121 = vst.msk [vmem:[#allocation4 + $0x20] sm:$0xff] %vm84_vm0, %v2938_v0 }
  0x39   :  { %122 = vst.msk [vmem:[#allocation4 + $0x28] sm:$0xff] %vm84_vm0, %v2938_v0 }
  0x3a   :  { %123 = vst.msk [vmem:[#allocation4 + $0x30] sm:$0xff] %vm84_vm0, %v2938_v0  ;;  %190 = vmatpush.xpose.msra.mxu0 %v171_v15  ;;  %2018 = vmatpush.xpose.msra.mxu2 %v171_v15 }
  0x3b   :  { %124 = vst.msk [vmem:[#allocation4 + $0x38] sm:$0xff] %vm84_vm0, %v2938_v0 }
  0x3c   :  { %125 = vst.msk [vmem:[#allocation4 + $0x40] sm:$0xff] %vm84_vm0, %v2938_v0 }
  0x3d   :  { %126 = vst.msk [vmem:[#allocation4 + $0x48] sm:$0xff] %vm84_vm0, %v2938_v0  ;;  %379 = vmatpush.bf16.xpose.msra.mxu1 %v2003_v16  ;;  %2030 = vmatpush.bf16.xpose.msra.mxu3 %v2003_v16 }
  0x3e   :  { %127 = vst.msk [vmem:[#allocation4 + $0x50] sm:$0xff] %vm84_vm0, %v2938_v0  ;;  %191 = vmatpush.xpose.msra.mxu0 %v170_v17  ;;  %2019 = vmatpush.xpose.msra.mxu2 %v170_v17 }
  0x3f   :  { %128 = vst.msk [vmem:[#allocation4 + $0x58] sm:$0xff] %vm84_vm0, %v2938_v0 }
  0x40   :  { %129 = vst.msk [vmem:[#allocation4 + $0x60] sm:$0xff] %vm84_vm0, %v2938_v0 }
  0x41   :  { %130 = vst.msk [vmem:[#allocation4 + $0x68] sm:$0xff] %vm84_vm0, %v2938_v0 }
  0x42   :  { %131 = vst.msk [vmem:[#allocation4 + $0x70] sm:$0xff] %vm84_vm0, %v2938_v0  ;;  %192 = vmatpush.xpose.msra.mxu0 %v169_v18  ;;  %2020 = vmatpush.xpose.msra.mxu2 %v169_v18 }
  0x43   :  { %132 = vst.msk [vmem:[#allocation4 + $0x78] sm:$0xff] %vm84_vm0, %v2938_v0 }
  0x44   :  { %133 = vst.msk [vmem:[#allocation5] sm:$0xff] %vm84_vm0, %v2938_v0 }
  0x45   :  { %134 = vst.msk [vmem:[#allocation5 + $0x8] sm:$0xff] %vm84_vm0, %v2938_v0  ;;  %380 = vmatpush.bf16.xpose.msra.mxu1 %v2002_v19  ;;  %2031 = vmatpush.bf16.xpose.msra.mxu3 %v2002_v19 }
  0x46   :  { %135 = vst.msk [vmem:[#allocation5 + $0x10] sm:$0xff] %vm84_vm0, %v2938_v0  ;;  %193 = vmatpush.xpose.msra.mxu0 %v168_v20  ;;  %2021 = vmatpush.xpose.msra.mxu2 %v168_v20 }
  0x47   :  { %136 = vst.msk [vmem:[#allocation5 + $0x18] sm:$0xff] %vm84_vm0, %v2938_v0 }
  0x48   :  { %137 = vst.msk [vmem:[#allocation5 + $0x20] sm:$0xff] %vm84_vm0, %v2938_v0 }
  0x49   :  { %138 = vst.msk [vmem:[#allocation5 + $0x28] sm:$0xff] %vm84_vm0, %v2938_v0 }
  0x4a   :  { %139 = vst.msk [vmem:[#allocation5 + $0x30] sm:$0xff] %vm84_vm0, %v2938_v0  ;;  %194 = vmatpush.xpose.msra.mxu0 %v167_v21  ;;  %2022 = vmatpush.xpose.msra.mxu2 %v167_v21 }
  0x4b   :  { %140 = vst.msk [vmem:[#allocation5 + $0x38] sm:$0xff] %vm84_vm0, %v2938_v0 }
  0x4c   :  { %141 = vst.msk [vmem:[#allocation5 + $0x40] sm:$0xff] %vm84_vm0, %v2938_v0 }
  0x4d   :  { %142 = vst.msk [vmem:[#allocation5 + $0x48] sm:$0xff] %vm84_vm0, %v2938_v0  ;;  %381 = vmatpush.bf16.xpose.msra.mxu1 %v2001_v22  ;;  %2032 = vmatpush.bf16.xpose.msra.mxu3 %v2001_v22 }
  0x4e   :  { %143 = vst.msk [vmem:[#allocation5 + $0x50] sm:$0xff] %vm84_vm0, %v2938_v0  ;;  %195 = vmatpush.xpose.msra.mxu0 %v166_v23  ;;  %2023 = vmatpush.xpose.msra.mxu2 %v166_v23  ;;  %v439_v23 = vadd.s32 24, %v2436_v50 }
  0x4f   :  { %144 = vst.msk [vmem:[#allocation5 + $0x58] sm:$0xff] %vm84_vm0, %v2938_v0 }
  0x50   :  { %145 = vst.msk [vmem:[#allocation5 + $0x60] sm:$0xff] %vm84_vm0, %v2938_v0 }
  0x51   :  { %146 = vst.msk [vmem:[#allocation5 + $0x68] sm:$0xff] %vm84_vm0, %v2938_v0 }
  0x52   :  { %147 = vst.msk [vmem:[#allocation5 + $0x70] sm:$0xff] %vm84_vm0, %v2938_v0  ;;  %196 = vmatpush.xpose.msra.mxu0 %v165_v24  ;;  %2024 = vmatpush.xpose.msra.mxu2 %v165_v24 }
  0x53   :  { %148 = vst.msk [vmem:[#allocation5 + $0x78] sm:$0xff] %vm84_vm0, %v2938_v0 }
  0x54   :  { %382 = vmatmul.bf16.vlgmr.msra.gmra.mxu1 %v1993_v25  ;;  %402 = vmatmul.bf16.vlgmr.msra.gmra.mxu3 %v1997_v26 }
  0x55   :  { %197 = vmatmul.f32.vlgmr.msra.gmra.mxu0 %v149_v27  ;;  %221 = vmatmul.f32.vlgmr.msra.gmra.mxu2 %v157_v28  ;;  %v447_v27 = vadd.s32 88, %v2436_v50 }
  0x5d   :  { %200 = vmatmul.f32.gmra.mxu0 %v150_v29  ;;  %224 = vmatmul.f32.gmra.mxu2 %v158_v30 }
  0x64   :  { %407 = vmatmul.bf16.gmra.mxu3 %v1998_v31  ;;  %387 = vmatmul.bf16.gmra.mxu1 %v1994_v33  ;;  %v440_v33 = vadd.s32 32, %v2436_v50 }
  0x65   :  { %227 = vmatmul.f32.gmra.mxu2 %v159_v32  ;;  %203 = vmatmul.f32.gmra.mxu0 %v151_v34  ;;  %v1261_v34 = vld [vmem:[#allocation4] sm:$0xff] }
  0x6d   :  { %230 = vmatmul.f32.gmra.mxu2 %v160_v35  ;;  %206 = vmatmul.f32.gmra.mxu0 %v152_v36 }
  0x74   :  { %392 = vmatmul.bf16.gmra.mxu1 %v1995_v37  ;;  %412 = vmatmul.bf16.gmra.mxu3 %v1999_v39 }
  0x75   :  { %209 = vmatmul.f32.gmra.mxu0 %v153_v38  ;;  %233 = vmatmul.f32.gmra.mxu2 %v161_v40 }
  0x7d   :  { %212 = vmatmul.f32.gmra.mxu0 %v154_v41  ;;  %236 = vmatmul.f32.gmra.mxu2 %v162_v42 }
  0x84   :  { %397 = vmatmul.bf16.gmra.mxu1 %v1996_v43  ;;  %417 = vmatmul.bf16.gmra.mxu3 %v2000_v45 }
  0x85   :  { %215 = vmatmul.f32.gmra.mxu0 %v155_v44  ;;  %239 = vmatmul.f32.gmra.mxu2 %v163_v46  ;;  %v448_v44 = vadd.s32 96, %v2436_v50 }
  0x8d   :  { %218 = vmatmul.f32.gmra.mxu0 %v156_v47  ;;  %242 = vmatmul.f32.gmra.mxu2 %v164_v48 }
  0xd1   :  { %v383_v52 = vpop.f32.mrf.mxu1 }
  0xd2   :  { %v198_v53 = vpop.f32.mrf.mxu0  ;;  %vm489_vm2 = vcmp.ne.f32.partialorder %v383_v52, 0.0  ;;  %vm521_vm3 = vcmp.eq.f32.partialorder %v383_v52, 1.0 }
  0xd3   :  { %vm537_vm4 = vmand %vm521_vm3, %vm473_vm1  ;;  %vm475_vm3 = vcmp.ne.s32.totalorder %v438_v4, %v2438_v51  ;;  %v1310_v4 = vld [vmem:[#allocation5 + $0x8] sm:$0xff] }
  0xd4   :  { %v569_v55 = vsel %vm537_vm4, 1.0, %v2938_v0  ;;  %v617_v56 = vsel %vm537_vm4, %v198_v53, 0.0  ;;  %vm505_vm5 = vmand %vm489_vm2, %vm473_vm1 }
  0xd5   :  { %585 = vadd.xlane.f32.xlu0 %v569_v55  ;;  %633 = vadd.xlane.f32.xlu1 %v617_v56  ;;  %v2444_v57 = vsel %vm505_vm5, %v198_v53, -1e+30  ;;  %v441_v53 = vadd.s32 40, %v2436_v50 }
  0xd6   :  { %924 = vmax.xlane.f32.xlu2 %v2444_v57 }
  0xd7   :  { %v403_v58 = vpop.f32.mrf.mxu3 }
  0xd8   :  { %v222_v59 = vpop.f32.mrf.mxu2  ;;  %vm497_vm7 = vcmp.ne.f32.partialorder %v403_v58, 0.0  ;;  %vm529_vm8 = vcmp.eq.f32.partialorder %v403_v58, 1.0 }
  0xd9   :  { %v385_v60 = vpop.f32.mrf.mxu1  ;;  %vm545_vm9 = vmand %vm529_vm8, %vm481_vm6 }
  0xda   :  { %v625_v62 = vsel %vm545_vm9, %v222_v59, 0.0  ;;  %vm513_vm10 = vmand %vm497_vm7, %vm481_vm6  ;;  %v577_v2 = vsel %vm545_vm9, 1.0, %v2938_v0  ;;  %vm522_vm11 = vcmp.eq.f32.partialorder %v385_v60, 1.0  ;;  %v201_v8 = vpop.f32.mrf.mxu0  ;;  %vm490_vm4 = vcmp.ne.f32.partialorder %v385_v60, 0.0 }
  0xdb   :  { %v2450_v1 = vsel %vm513_vm10, %v222_v59, -1e+30  ;;  %vm538_vm15 = vmand %vm522_vm11, %vm474_vm12  ;;  %vm483_vm11 = vcmp.ne.s32.totalorder %v446_v13, %v2438_v51  ;;  %v449_v60 = vadd.s32 104, %v2436_v50 }
  0xdc   :  { %v570_v9 = vsel %vm538_vm15, 1.0, %v2938_v0  ;;  %v618_v11 = vsel %vm538_vm15, %v201_v8, 0.0  ;;  %vm506_vm7 = vmand %vm490_vm4, %vm474_vm12  ;;  %vm476_vm15 = vcmp.ne.s32.totalorder %v439_v23, %v2438_v51 }
  0xdd   :  { %649 = vadd.xlane.f32.xlu0 %v625_v62  ;;  %940 = vmax.xlane.f32.xlu1 %v2450_v1  ;;  %v2483_v16 = vsel %vm506_vm7, %v201_v8, -1e+30  ;;  %v2226_v62 = vmov -1e+30  }
  0xde   :  { %601 = vadd.xlane.f32.xlu2 %v577_v2  ;;  %85 = vst.msk [vmem:[#allocation2] sm:$0xff] %vm84_vm0, %v2226_v62 }
  0xdf   :  { %v405_v3 = vpop.f32.mrf.mxu3  ;;  %86 = vst.msk [vmem:[#allocation2 + $0x8] sm:$0xff] %vm84_vm0, %v2226_v62 }
  0xe0   :  { %vm530_vm14 = vcmp.eq.f32.partialorder %v405_v3, 1.0  ;;  %v225_v5 = vpop.f32.mrf.mxu2  ;;  %vm498_vm5 = vcmp.ne.f32.partialorder %v405_v3, 0.0  ;;  %87 = vst.msk [vmem:[#allocation2 + $0x10] sm:$0xff] %vm84_vm0, %v2226_v62 }
  0xe1   :  { %vm2461_vm1 = vmand %vm530_vm14, %vm482_vm13  ;;  %v388_v7 = vpop.f32.mrf.mxu1  ;;  %88 = vst.msk [vmem:[#allocation2 + $0x18] sm:$0xff] %vm84_vm0, %v2226_v62 }
  0xe2   :  { %v626_v10 = vsel %vm2461_vm1, %v225_v5, 0.0  ;;  %vm523_vm2 = vcmp.eq.f32.partialorder %v388_v7, 1.0  ;;  %vm514_vm8 = vmand %vm498_vm5, %vm482_vm13  ;;  %vm491_vm9 = vcmp.ne.f32.partialorder %v388_v7, 0.0  ;;  %v204_v18 = vpop.f32.mrf.mxu0  ;;  %v578_v25 = vsel %vm2461_vm1, 1.0, %v2938_v0  ;;  %89 = vst.msk [vmem:[#allocation2 + $0x20] sm:$0xff] %vm84_vm0, %v2226_v62 }
  0xe3   :  { %vm2471_vm6 = vmand %vm523_vm2, %vm475_vm3  ;;  %v2485_v17 = vsel %vm514_vm8, %v225_v5, -1e+30  ;;  %vm484_vm5 = vcmp.ne.s32.totalorder %v447_v27, %v2438_v51  ;;  %90 = vst.msk [vmem:[#allocation2 + $0x28] sm:$0xff] %vm84_vm0, %v2226_v62  ;;  %v442_v5 = vadd.s32 48, %v2436_v50  ;;  %v451_v27 = vadd.s32 120, %v2436_v50 }
  0xe4   :  { %v571_v14 = vsel %vm2471_vm6, 1.0, %v2938_v0  ;;  %vm507_vm12 = vmand %vm491_vm9, %vm475_vm3  ;;  %v619_v29 = vsel %vm2471_vm6, %v204_v18, 0.0  ;;  %91 = vst.msk [vmem:[#allocation2 + $0x30] sm:$0xff] %vm84_vm0, %v2226_v62 }
  0xe5   :  { %587 = vadd.xlane.f32.xlu0 %v570_v9  ;;  %651 = vadd.xlane.f32.xlu1 %v626_v10  ;;  %v2498_v21 = vsel %vm507_vm12, %v204_v18, -1e+30  ;;  %92 = vst.msk [vmem:[#allocation2 + $0x38] sm:$0xff] %vm84_vm0, %v2226_v62 }
  0xe6   :  { %635 = vadd.xlane.f32.xlu2 %v618_v11  ;;  %93 = vst.msk [vmem:[#allocation2 + $0x40] sm:$0xff] %vm84_vm0, %v2226_v62  ;;  %v450_v11 = vadd.s32 112, %v2436_v50 }
  0xe7   :  { %v408_v15 = vpop.f32.mrf.mxu3  ;;  %94 = vst.msk [vmem:[#allocation2 + $0x48] sm:$0xff] %vm84_vm0, %v2226_v62 }
  0xe8   :  { %vm531_vm10 = vcmp.eq.f32.partialorder %v408_v15, 1.0  ;;  %v228_v20 = vpop.f32.mrf.mxu2  ;;  %vm499_vm1 = vcmp.ne.f32.partialorder %v408_v15, 0.0  ;;  %95 = vst.msk [vmem:[#allocation2 + $0x50] sm:$0xff] %vm84_vm0, %v2226_v62 }
  0xe9   :  { %vm2494_vm13 = vmand %vm531_vm10, %vm483_vm11  ;;  %v390_v24 = vpop.f32.mrf.mxu1  ;;  %vm477_vm10 = vcmp.ne.s32.totalorder %v440_v33, %v2438_v51  ;;  %96 = vst.msk [vmem:[#allocation2 + $0x58] sm:$0xff] %vm84_vm0, %v2226_v62 }
  0xea   :  { %v627_v22 = vsel %vm2494_vm13, %v228_v20, 0.0  ;;  %vm492_vm14 = vcmp.ne.f32.partialorder %v390_v24, 0.0  ;;  %v207_v26 = vpop.f32.mrf.mxu0  ;;  %v579_v30 = vsel %vm2494_vm13, 1.0, %v2938_v0  ;;  %vm524_vm3 = vcmp.eq.f32.partialorder %v390_v24, 1.0  ;;  %vm515_vm7 = vmand %vm499_vm1, %vm483_vm11  ;;  %97 = vst.msk [vmem:[#allocation2 + $0x60] sm:$0xff] %vm84_vm0, %v2226_v62 }
  0xeb   :  { %vm508_vm2 = vmand %vm492_vm14, %vm476_vm15  ;;  %v2535_v36 = vsel %vm515_vm7, %v228_v20, -1e+30  ;;  %vm485_vm1 = vcmp.ne.s32.totalorder %v448_v44, %v2438_v51  ;;  %98 = vst.msk [vmem:[#allocation2 + $0x68] sm:$0xff] %vm84_vm0, %v2226_v62  ;;  %v443_v20 = vadd.s32 56, %v2436_v50  ;;  %v2628_v50 = vld [vmem:[#allocation2] sm:$0xff] }
  0xec   :  { %v2516_v31 = vsel %vm508_vm2, %v207_v26, -1e+30  ;;  %vm2524_vm6 = vmand %vm524_vm3, %vm476_vm15  ;;  %99 = vst.msk [vmem:[#allocation2 + $0x70] sm:$0xff] %vm84_vm0, %v2226_v62 }
  0xed   :  { %589 = vadd.xlane.f32.xlu1 %v571_v14  ;;  %926 = vmax.xlane.f32.xlu0 %v2483_v16  ;;  %v572_v37 = vsel %vm2524_vm6, 1.0, %v2938_v0  ;;  %v620_v43 = vsel %vm2524_vm6, %v207_v26, 0.0  ;;  %vm478_vm6 = vcmp.ne.s32.totalorder %v441_v53, %v2438_v51  ;;  %100 = vst.msk [vmem:[#allocation2 + $0x78] sm:$0xff] %vm84_vm0, %v2226_v62  ;;  %v1269_v53 = vld [vmem:[#allocation4 + $0x40] sm:$0xff] }
  0xee   :  { %942 = vmax.xlane.f32.xlu2 %v2485_v17 }
  0xef   :  { %v410_v28 = vpop.f32.mrf.mxu3 }
  0xf0   :  { %vm532_vm4 = vcmp.eq.f32.partialorder %v410_v28, 1.0  ;;  %v231_v40 = vpop.f32.mrf.mxu2  ;;  %vm500_vm12 = vcmp.ne.f32.partialorder %v410_v28, 0.0  ;;  %v2227_v28 = vmov 0  }
  0xf1   :  { %vm2531_vm8 = vmand %vm532_vm4, %vm484_vm5  ;;  %v393_v35 = vpop.f32.mrf.mxu1  ;;  %2044 = vset.pattern.permute.xlu0 %v2227_v28  ;;  %2045 = vset.pattern.permute.xlu2 %v2227_v28 }
  0xf2   :  { %vm525_vm9 = vcmp.eq.f32.partialorder %v393_v35, 1.0  ;;  %v580_v38 = vsel %vm2531_vm8, 1.0, %v2938_v0  ;;  %v628_v42 = vsel %vm2531_vm8, %v231_v40, 0.0  ;;  %vm493_vm13 = vcmp.ne.f32.partialorder %v393_v35, 0.0  ;;  %vm516_vm14 = vmand %vm500_vm12, %vm484_vm5  ;;  %v210_v45 = vpop.f32.mrf.mxu0  ;;  %2046 = vset.pattern.permute.xlu1 %v2227_v28  ;;  %v1309_v35 = vld [vmem:[#allocation5] sm:$0xff]  ;;  %v1270_v28 = vld [vmem:[#allocation4 + $0x48] sm:$0xff] }
  0xf3   :  { %vm2545_vm11 = vmand %vm525_vm9, %vm477_vm10  ;;  %v2559_v47 = vsel %vm516_vm14, %v231_v40, -1e+30  ;;  %vm486_vm12 = vcmp.ne.s32.totalorder %v449_v60, %v2438_v51 }
  0xf4   :  { %v573_v41 = vsel %vm2545_vm11, 1.0, %v2938_v0  ;;  %vm509_vm15 = vmand %vm493_vm13, %vm477_vm10  ;;  %v621_v49 = vsel %vm2545_vm11, %v210_v45, 0.0 }
  0xf5   :  { %603 = vadd.xlane.f32.xlu0 %v578_v25  ;;  %928 = vmax.xlane.f32.xlu1 %v2498_v21  ;;  %v2561_v48 = vsel %vm509_vm15, %v210_v45, -1e+30 }
  0xf6   :  { %653 = vadd.xlane.f32.xlu2 %v627_v22 }
  0xf7   :  { %v413_v46 = vpop.f32.mrf.mxu3 }
  0xf8   :  { %vm533_vm2 = vcmp.eq.f32.partialorder %v413_v46, 1.0  ;;  %vm501_vm3 = vcmp.ne.f32.partialorder %v413_v46, 0.0  ;;  %v234_v52 = vpop.f32.mrf.mxu2 }
  0xf9   :  { %vm549_vm4 = vmand %vm533_vm2, %vm485_vm1  ;;  %v395_v54 = vpop.f32.mrf.mxu1 }
  0xfa   :  { %vm517_vm5 = vmand %vm501_vm3, %vm485_vm1  ;;  %v629_v55 = vsel %vm549_vm4, %v234_v52, 0.0  ;;  %v581_v56 = vsel %vm549_vm4, 1.0, %v2938_v0  ;;  %vm526_vm7 = vcmp.eq.f32.partialorder %v395_v54, 1.0  ;;  %vm494_vm8 = vcmp.ne.f32.partialorder %v395_v54, 0.0  ;;  %v213_v59 = vpop.f32.mrf.mxu0 }
  0xfb   :  { %v2570_v58 = vsel %vm517_vm5, %v234_v52, -1e+30  ;;  %vm542_vm9 = vmand %vm526_vm7, %vm478_vm6  ;;  %vm479_vm1 = vcmp.ne.s32.totalorder %v442_v5, %v2438_v51  ;;  %v2643_v52 = vld [vmem:[#allocation2 + $0x40] sm:$0xff] }
  0xfc   :  { %vm510_vm10 = vmand %vm494_vm8, %vm478_vm6  ;;  %v622_v63 = vsel %vm542_vm9, %v213_v59, 0.0  ;;  %v574_v3 = vsel %vm542_vm9, 1.0, %v2938_v0  ;;  %vm487_vm6 = vcmp.ne.s32.totalorder %v450_v11, %v2438_v51 }
  0xfd   :  { %637 = vadd.xlane.f32.xlu0 %v619_v29  ;;  %605 = vadd.xlane.f32.xlu1 %v579_v30  ;;  %v2577_v2 = vsel %vm510_vm10, %v213_v59, -1e+30 }
  0xfe   :  { %930 = vmax.xlane.f32.xlu2 %v2516_v31 }
  0xff   :  { %v415_v61 = vpop.f32.mrf.mxu3 }
 0x100   :  { %vm534_vm11 = vcmp.eq.f32.partialorder %v415_v61, 1.0  ;;  %vm502_vm13 = vcmp.ne.f32.partialorder %v415_v61, 0.0  ;;  %v237_v6 = vpop.f32.mrf.mxu2 }
 0x101   :  { %vm2586_vm14 = vmand %vm534_vm11, %vm486_vm12  ;;  %v398_v7 = vpop.f32.mrf.mxu1 }
 0x102   :  { %vm518_vm15 = vmand %vm502_vm13, %vm486_vm12  ;;  %vm527_vm2 = vcmp.eq.f32.partialorder %v398_v7, 1.0  ;;  %v582_v9 = vsel %vm2586_vm14, 1.0, %v2938_v0  ;;  %vm495_vm3 = vcmp.ne.f32.partialorder %v398_v7, 0.0  ;;  %v630_v10 = vsel %vm2586_vm14, %v237_v6, 0.0  ;;  %v216_v12 = vpop.f32.mrf.mxu0 }
 0x103   :  { %v2595_v8 = vsel %vm518_vm15, %v237_v6, -1e+30  ;;  %vm543_vm4 = vmand %vm527_vm2, %vm479_vm1  ;;  %vm480_vm12 = vcmp.ne.s32.totalorder %v443_v20, %v2438_v51 }
 0x104   :  { %vm511_vm5 = vmand %vm495_vm3, %vm479_vm1  ;;  %v575_v14 = vsel %vm543_vm4, 1.0, %v2938_v0  ;;  %v623_v15 = vsel %vm543_vm4, %v216_v12, 0.0  ;;  %vm488_vm1 = vcmp.ne.s32.totalorder %v451_v27, %v2438_v51 }
 0x105   :  { %944 = vmax.xlane.f32.xlu0 %v2535_v36  ;;  %591 = vadd.xlane.f32.xlu1 %v572_v37  ;;  %v2612_v18 = vsel %vm511_vm5, %v216_v12, -1e+30  ;;  %v1263_v12 = vld [vmem:[#allocation4 + $0x10] sm:$0xff] }
 0x106   :  { %607 = vadd.xlane.f32.xlu2 %v580_v38 }
 0x107   :  { %v418_v13 = vpop.f32.mrf.mxu3 }
 0x108   :  { %vm535_vm7 = vcmp.eq.f32.partialorder %v418_v13, 1.0  ;;  %vm503_vm8 = vcmp.ne.f32.partialorder %v418_v13, 0.0  ;;  %v240_v19 = vpop.f32.mrf.mxu2  ;;  %v2657_v13 = vld [vmem:[#allocation2 + $0x8] sm:$0xff] }
 0x109   :  { %vm551_vm9 = vmand %vm535_vm7, %vm487_vm6  ;;  %v400_v22 = vpop.f32.mrf.mxu1 }
 0x10a   :  { %vm519_vm10 = vmand %vm503_vm8, %vm487_vm6  ;;  %v631_v23 = vsel %vm551_vm9, %v240_v19, 0.0  ;;  %v583_v25 = vsel %vm551_vm9, 1.0, %v2938_v0  ;;  %vm528_vm11 = vcmp.eq.f32.partialorder %v400_v22, 1.0  ;;  %vm496_vm13 = vcmp.ne.f32.partialorder %v400_v22, 0.0  ;;  %v219_v26 = vpop.f32.mrf.mxu0 }
 0x10b   :  { %v2617_v24 = vsel %vm519_vm10, %v240_v19, -1e+30  ;;  %vm544_vm14 = vmand %vm528_vm11, %vm480_vm12 }
 0x10c   :  { %vm512_vm15 = vmand %vm496_vm13, %vm480_vm12  ;;  %v576_v30 = vsel %vm544_vm14, 1.0, %v2938_v0  ;;  %v624_v33 = vsel %vm544_vm14, %v219_v26, 0.0 }
 0x10d   :  { %655 = vadd.xlane.f32.xlu0 %v628_v42  ;;  %639 = vadd.xlane.f32.xlu1 %v620_v43  ;;  %v2624_v32 = vsel %vm512_vm15, %v219_v26, -1e+30 }
 0x10e   :  { %593 = vadd.xlane.f32.xlu2 %v573_v41 }
 0x10f   :  { %v420_v29 = vpop.f32.mrf.mxu3 }
 0x110   :  { %vm536_vm2 = vcmp.eq.f32.partialorder %v420_v29, 1.0  ;;  %vm504_vm3 = vcmp.ne.f32.partialorder %v420_v29, 0.0  ;;  %v243_v39 = vpop.f32.mrf.mxu2  ;;  %v2679_v29 = vld [vmem:[#allocation2 + $0x10] sm:$0xff] }
 0x111   :  { %vm552_vm4 = vmand %vm536_vm2, %vm488_vm1 }
 0x112   :  { %vm520_vm5 = vmand %vm504_vm3, %vm488_vm1  ;;  %v632_v44 = vsel %vm552_vm4, %v243_v39, 0.0  ;;  %v584_v45 = vsel %vm552_vm4, 1.0, %v2938_v0  ;;  %v2800_v0 = vld [vmem:[#allocation2 + $0x38] sm:$0xff] }
 0x113   :  { %v2640_v46 = vsel %vm520_vm5, %v243_v39, -1e+30 }
 0x115   :  { %946 = vmax.xlane.f32.xlu1 %v2559_v47  ;;  %932 = vmax.xlane.f32.xlu0 %v2561_v48 }
 0x116   :  { %641 = vadd.xlane.f32.xlu2 %v621_v49  ;;  %v1317_v49 = vld [vmem:[#allocation5 + $0x40] sm:$0xff] }
 0x11d   :  { %657 = vadd.xlane.f32.xlu1 %v629_v55  ;;  %609 = vadd.xlane.f32.xlu0 %v581_v56 }
 0x11e   :  { %948 = vmax.xlane.f32.xlu2 %v2570_v58 }
 0x125   :  { %643 = vadd.xlane.f32.xlu0 %v622_v63  ;;  %934 = vmax.xlane.f32.xlu1 %v2577_v2  ;;  %v1262_v63 = vld [vmem:[#allocation4 + $0x8] sm:$0xff] }
 0x126   :  { %595 = vadd.xlane.f32.xlu2 %v574_v3  ;;  %v1318_v3 = vld [vmem:[#allocation5 + $0x48] sm:$0xff] }
 0x12d   :  { %950 = vmax.xlane.f32.xlu0 %v2595_v8  ;;  %611 = vadd.xlane.f32.xlu1 %v582_v9 }
 0x12e   :  { %659 = vadd.xlane.f32.xlu2 %v630_v10 }
 0x135   :  { %597 = vadd.xlane.f32.xlu0 %v575_v14  ;;  %645 = vadd.xlane.f32.xlu1 %v623_v15  ;;  %v2659_v14 = vld [vmem:[#allocation2 + $0x48] sm:$0xff] }
 0x136   :  { %936 = vmax.xlane.f32.xlu2 %v2612_v18 }
 0x13d   :  { %661 = vadd.xlane.f32.xlu0 %v631_v23  ;;  %952 = vmax.xlane.f32.xlu1 %v2617_v24 }
 0x13e   :  { %613 = vadd.xlane.f32.xlu2 %v583_v25 }
 0x145   :  { %599 = vadd.xlane.f32.xlu1 %v576_v30  ;;  %938 = vmax.xlane.f32.xlu0 %v2624_v32  ;;  %v1319_v30 = vld [vmem:[#allocation5 + $0x50] sm:$0xff] }
 0x146   :  { %647 = vadd.xlane.f32.xlu2 %v624_v33 }
 0x148   :  { %v586_v37 = vpop.xlane.xlu0 %585  ;;  %v634_v38 = vpop.xlane.xlu1 %633 }
 0x149   :  { %v1277_v40 = vadd.f32 %v1261_v34, %v586_v37  ;;  %v1325_v41 = vadd.f32 %v1309_v35, %v634_v38  ;;  %v925_v42 = vpop.xlane.xlu2 %924 }
 0x14a   :  { %v2631_v43 = vmax.f32 %v2628_v50, %v925_v42  ;;  %v1271_v42 = vld [vmem:[#allocation4 + $0x50] sm:$0xff] }
 0x14b   :  { %1293 = vst.msk [vmem:[#allocation4] sm:$0xff] %vm84_vm0, %v1277_v40 }
 0x14c   :  { %1341 = vst.msk [vmem:[#allocation5] sm:$0xff] %vm84_vm0, %v1325_v41  ;;  %v1311_v41 = vld [vmem:[#allocation5 + $0x10] sm:$0xff] }
 0x14d   :  { %1245 = vst.msk [vmem:[#allocation2] sm:$0xff] %vm84_vm0, %v2631_v43  ;;  %663 = vadd.xlane.f32.xlu1 %v632_v44  ;;  %615 = vadd.xlane.f32.xlu0 %v584_v45  ;;  %v2692_v44 = vld [vmem:[#allocation2 + $0x18] sm:$0xff] }
 0x14e   :  { %954 = vmax.xlane.f32.xlu2 %v2640_v46 }
 0x150   :  { %v650_v54 = vpop.xlane.xlu0 %649  ;;  %v941_v55 = vpop.xlane.xlu1 %940 }
 0x151   :  { %v1333_v56 = vadd.f32 %v1317_v49, %v650_v54  ;;  %v2646_v59 = vmax.f32 %v2643_v52, %v941_v55  ;;  %v602_v60 = vpop.xlane.xlu2 %601 }
 0x152   :  { %v1285_v61 = vadd.f32 %v1269_v53, %v602_v60 }
 0x153   :  { %1349 = vst.msk [vmem:[#allocation5 + $0x40] sm:$0xff] %vm84_vm0, %v1333_v56 }
 0x154   :  { %1253 = vst.msk [vmem:[#allocation2 + $0x40] sm:$0xff] %vm84_vm0, %v2646_v59 }
 0x155   :  { %1301 = vst.msk [vmem:[#allocation4 + $0x40] sm:$0xff] %vm84_vm0, %v1285_v61  ;;  %v2704_v61 = vld [vmem:[#allocation2 + $0x50] sm:$0xff] }
 0x158   :  { %v588_v5 = vpop.xlane.xlu0 %587  ;;  %v652_v6 = vpop.xlane.xlu1 %651 }
 0x159   :  { %v1278_v7 = vadd.f32 %v1262_v63, %v588_v5  ;;  %v1334_v9 = vadd.f32 %v1318_v3, %v652_v6  ;;  %v636_v10 = vpop.xlane.xlu2 %635  ;;  %v1264_v63 = vld [vmem:[#allocation4 + $0x18] sm:$0xff] }
 0x15a   :  { %v1326_v11 = vadd.f32 %v1310_v4, %v636_v10  ;;  %v1272_v3 = vld [vmem:[#allocation4 + $0x58] sm:$0xff] }
 0x15b   :  { %1294 = vst.msk [vmem:[#allocation4 + $0x8] sm:$0xff] %vm84_vm0, %v1278_v7 }
 0x15c   :  { %1350 = vst.msk [vmem:[#allocation5 + $0x48] sm:$0xff] %vm84_vm0, %v1334_v9 }
 0x15d   :  { %1342 = vst.msk [vmem:[#allocation5 + $0x8] sm:$0xff] %vm84_vm0, %v1326_v11 }
 0x160   :  { %v590_v15 = vpop.xlane.xlu1 %589  ;;  %v927_v19 = vpop.xlane.xlu0 %926 }
 0x161   :  { %v1279_v20 = vadd.f32 %v1263_v12, %v590_v15  ;;  %v943_v22 = vpop.xlane.xlu2 %942  ;;  %v2662_v23 = vmax.f32 %v2657_v13, %v927_v19  ;;  %1022 = vperm.xlu0 %2044, %v2631_v43   ;;  %v1320_v12 = vld [vmem:[#allocation5 + $0x58] sm:$0xff]  ;;  %v1265_v19 = vld [vmem:[#allocation4 + $0x20] sm:$0xff] }
 0x162   :  { %v2666_v25 = vmax.f32 %v2659_v14, %v943_v22  ;;  %v1312_v15 = vld [vmem:[#allocation5 + $0x18] sm:$0xff] }
 0x163   :  { %1295 = vst.msk [vmem:[#allocation4 + $0x10] sm:$0xff] %vm84_vm0, %v1279_v20 }
 0x164   :  { %1254 = vst.msk [vmem:[#allocation2 + $0x48] sm:$0xff] %vm84_vm0, %v2666_v25 }
 0x165   :  { %1246 = vst.msk [vmem:[#allocation2 + $0x8] sm:$0xff] %vm84_vm0, %v2662_v23 }
 0x166   :  { %1062 = vperm.xlu2 %2045, %v2646_v59   ;;  %1027 = vperm.xlu1 %2046, %v2662_v23  }
 0x168   :  { %v604_v33 = vpop.xlane.xlu0 %603  ;;  %v929_v34 = vpop.xlane.xlu1 %928 }
 0x169   :  { %v654_v35 = vpop.xlane.xlu2 %653  ;;  %v1286_v37 = vadd.f32 %v1270_v28, %v604_v33  ;;  %v2682_v38 = vmax.f32 %v2679_v29, %v929_v34 }
 0x16a   :  { %v1335_v39 = vadd.f32 %v1319_v30, %v654_v35  ;;  %v2719_v35 = vld [vmem:[#allocation2 + $0x58] sm:$0xff] }
 0x16b   :  { %1302 = vst.msk [vmem:[#allocation4 + $0x48] sm:$0xff] %vm84_vm0, %v1286_v37  ;;  %v2721_v37 = vld [vmem:[#allocation2 + $0x20] sm:$0xff] }
 0x16c   :  { %1351 = vst.msk [vmem:[#allocation5 + $0x50] sm:$0xff] %vm84_vm0, %v1335_v39  ;;  %v1313_v39 = vld [vmem:[#allocation5 + $0x20] sm:$0xff] }
 0x16d   :  { %1247 = vst.msk [vmem:[#allocation2 + $0x10] sm:$0xff] %vm84_vm0, %v2682_v38 }
 0x16e   :  { %1032 = vperm.xlu2 %2045, %v2682_v38   ;;  %1067 = vperm.xlu1 %2046, %v2666_v25  }
 0x170   :  { %v638_v45 = vpop.xlane.xlu0 %637  ;;  %v606_v49 = vpop.xlane.xlu1 %605 }
 0x171   :  { %v1327_v53 = vadd.f32 %v1311_v41, %v638_v45  ;;  %v1287_v54 = vadd.f32 %v1271_v42, %v606_v49  ;;  %v931_v55 = vpop.xlane.xlu2 %930 }
 0x172   :  { %v2695_v56 = vmax.f32 %v2692_v44, %v931_v55 }
 0x173   :  { %1343 = vst.msk [vmem:[#allocation5 + $0x10] sm:$0xff] %vm84_vm0, %v1327_v53 }
 0x174   :  { %1303 = vst.msk [vmem:[#allocation4 + $0x50] sm:$0xff] %vm84_vm0, %v1287_v54 }
 0x175   :  { %1248 = vst.msk [vmem:[#allocation2 + $0x18] sm:$0xff] %vm84_vm0, %v2695_v56 }
 0x176   :  { %1037 = vperm.xlu2 %2045, %v2695_v56  }
 0x178   :  { %v945_v4 = vpop.xlane.xlu0 %944  ;;  %v592_v5 = vpop.xlane.xlu1 %591 }
 0x179   :  { %v2707_v6 = vmax.f32 %v2704_v61, %v945_v4  ;;  %v1280_v7 = vadd.f32 %v1264_v63, %v592_v5  ;;  %v608_v9 = vpop.xlane.xlu2 %607  ;;  %v1273_v4 = vld [vmem:[#allocation4 + $0x60] sm:$0xff] }
 0x17a   :  { %v1288_v10 = vadd.f32 %v1272_v3, %v608_v9  ;;  %v1321_v3 = vld [vmem:[#allocation5 + $0x60] sm:$0xff] }
 0x17b   :  { %1255 = vst.msk [vmem:[#allocation2 + $0x50] sm:$0xff] %vm84_vm0, %v2707_v6  ;;  %1072 = vperm.xlu0 %2044, %v2707_v6   ;;  %v2740_v5 = vld [vmem:[#allocation2 + $0x60] sm:$0xff] }
 0x17c   :  { %1296 = vst.msk [vmem:[#allocation4 + $0x18] sm:$0xff] %vm84_vm0, %v1280_v7 }
 0x17d   :  { %1304 = vst.msk [vmem:[#allocation4 + $0x58] sm:$0xff] %vm84_vm0, %v1288_v10 }
 0x180   :  { %v656_v20 = vpop.xlane.xlu0 %655  ;;  %v640_v22 = vpop.xlane.xlu1 %639 }
 0x181   :  { %v1336_v28 = vadd.f32 %v1320_v12, %v656_v20  ;;  %v1328_v30 = vadd.f32 %v1312_v15, %v640_v22  ;;  %v594_v33 = vpop.xlane.xlu2 %593  ;;  %v1314_v22 = vld [vmem:[#allocation5 + $0x28] sm:$0xff]  ;;  %v1268_v20 = vld [vmem:[#allocation4 + $0x38] sm:$0xff] }
 0x182   :  { %v1281_v34 = vadd.f32 %v1265_v19, %v594_v33 }
 0x183   :  { %1352 = vst.msk [vmem:[#allocation5 + $0x58] sm:$0xff] %vm84_vm0, %v1336_v28  ;;  %v2752_v28 = vld [vmem:[#allocation2 + $0x28] sm:$0xff] }
 0x184   :  { %1344 = vst.msk [vmem:[#allocation5 + $0x18] sm:$0xff] %vm84_vm0, %v1328_v30  ;;  %v1266_v30 = vld [vmem:[#allocation4 + $0x28] sm:$0xff] }
 0x185   :  { %1297 = vst.msk [vmem:[#allocation4 + $0x20] sm:$0xff] %vm84_vm0, %v1281_v34 }
 0x188   :  { %v947_v41 = vpop.xlane.xlu1 %946  ;;  %v933_v42 = vpop.xlane.xlu0 %932 }
 0x189   :  { %v2724_v45 = vmax.f32 %v2719_v35, %v947_v41  ;;  %v642_v49 = vpop.xlane.xlu2 %641  ;;  %v2727_v53 = vmax.f32 %v2721_v37, %v933_v42 }
 0x18a   :  { %v1329_v54 = vadd.f32 %v1313_v39, %v642_v49 }
 0x18b   :  { %1256 = vst.msk [vmem:[#allocation2 + $0x58] sm:$0xff] %vm84_vm0, %v2724_v45  ;;  %1077 = vperm.xlu2 %2045, %v2724_v45   ;;  %1042 = vperm.xlu1 %2046, %v2727_v53  }
 0x18c   :  { %1345 = vst.msk [vmem:[#allocation5 + $0x20] sm:$0xff] %vm84_vm0, %v1329_v54  ;;  %v1276_v54 = vld [vmem:[#allocation4 + $0x78] sm:$0xff] }
 0x18d   :  { %1249 = vst.msk [vmem:[#allocation2 + $0x20] sm:$0xff] %vm84_vm0, %v2727_v53 }
 0x190   :  { %v658_v7 = vpop.xlane.xlu1 %657  ;;  %v610_v9 = vpop.xlane.xlu0 %609 }
 0x191   :  { %v1337_v10 = vadd.f32 %v1321_v3, %v658_v7  ;;  %v949_v12 = vpop.xlane.xlu2 %948  ;;  %v1289_v15 = vadd.f32 %v1273_v4, %v610_v9  ;;  %v2764_v3 = vld [vmem:[#allocation2 + $0x68] sm:$0xff] }
 0x192   :  { %v2743_v19 = vmax.f32 %v2740_v5, %v949_v12  ;;  %v1274_v4 = vld [vmem:[#allocation4 + $0x68] sm:$0xff] }
 0x193   :  { %1353 = vst.msk [vmem:[#allocation5 + $0x60] sm:$0xff] %vm84_vm0, %v1337_v10  ;;  %v1322_v7 = vld [vmem:[#allocation5 + $0x68] sm:$0xff] }
 0x194   :  { %1257 = vst.msk [vmem:[#allocation2 + $0x60] sm:$0xff] %vm84_vm0, %v2743_v19  ;;  %1082 = vperm.xlu1 %2046, %v2743_v19  }
 0x195   :  { %1305 = vst.msk [vmem:[#allocation4 + $0x60] sm:$0xff] %vm84_vm0, %v1289_v15 }
 0x198   :  { %v644_v33 = vpop.xlane.xlu0 %643  ;;  %v935_v34 = vpop.xlane.xlu1 %934 }
 0x199   :  { %v596_v39 = vpop.xlane.xlu2 %595  ;;  %v1330_v41 = vadd.f32 %v1314_v22, %v644_v33  ;;  %v2755_v42 = vmax.f32 %v2752_v28, %v935_v34  ;;  %v1267_v34 = vld [vmem:[#allocation4 + $0x30] sm:$0xff] }
 0x19a   :  { %v1282_v49 = vadd.f32 %v1266_v30, %v596_v39  ;;  %v1315_v39 = vld [vmem:[#allocation5 + $0x30] sm:$0xff] }
 0x19b   :  { %1346 = vst.msk [vmem:[#allocation5 + $0x28] sm:$0xff] %vm84_vm0, %v1330_v41  ;;  %1047 = vperm.xlu2 %2045, %v2755_v42   ;;  %v2776_v41 = vld [vmem:[#allocation2 + $0x30] sm:$0xff] }
 0x19c   :  { %1298 = vst.msk [vmem:[#allocation4 + $0x28] sm:$0xff] %vm84_vm0, %v1282_v49  ;;  %v2788_v33 = vld [vmem:[#allocation2 + $0x70] sm:$0xff] }
 0x19d   :  { %1250 = vst.msk [vmem:[#allocation2 + $0x28] sm:$0xff] %vm84_vm0, %v2755_v42 }
 0x1a0   :  { %v951_v9 = vpop.xlane.xlu0 %950  ;;  %v612_v10 = vpop.xlane.xlu1 %611 }
 0x1a1   :  { %v660_v12 = vpop.xlane.xlu2 %659  ;;  %v2767_v15 = vmax.f32 %v2764_v3, %v951_v9  ;;  %v1290_v22 = vadd.f32 %v1274_v4, %v612_v10 }
 0x1a2   :  { %v1338_v30 = vadd.f32 %v1322_v7, %v660_v12 }
 0x1a3   :  { %1258 = vst.msk [vmem:[#allocation2 + $0x68] sm:$0xff] %vm84_vm0, %v2767_v15  ;;  %1087 = vperm.xlu0 %2044, %v2767_v15  }
 0x1a4   :  { %1354 = vst.msk [vmem:[#allocation5 + $0x68] sm:$0xff] %vm84_vm0, %v1338_v30 }
 0x1a5   :  { %1306 = vst.msk [vmem:[#allocation4 + $0x68] sm:$0xff] %vm84_vm0, %v1290_v22  ;;  %v1323_v22 = vld [vmem:[#allocation5 + $0x70] sm:$0xff] }
 0x1a8   :  { %v598_v49 = vpop.xlane.xlu0 %597  ;;  %v646_v9 = vpop.xlane.xlu1 %645 }
 0x1a9   :  { %v1283_v4 = vadd.f32 %v1267_v34, %v598_v49  ;;  %v1331_v7 = vadd.f32 %v1315_v39, %v646_v9  ;;  %v937_v10 = vpop.xlane.xlu2 %936  ;;  %v1275_v34 = vld [vmem:[#allocation4 + $0x70] sm:$0xff] }
 0x1aa   :  { %v2779_v12 = vmax.f32 %v2776_v41, %v937_v10 }
 0x1ab   :  { %1299 = vst.msk [vmem:[#allocation4 + $0x30] sm:$0xff] %vm84_vm0, %v1283_v4 }
 0x1ac   :  { %1347 = vst.msk [vmem:[#allocation5 + $0x30] sm:$0xff] %vm84_vm0, %v1331_v7  ;;  %1052 = vperm.xlu1 %2046, %v2779_v12  }
 0x1ad   :  { %1251 = vst.msk [vmem:[#allocation2 + $0x30] sm:$0xff] %vm84_vm0, %v2779_v12 }
 0x1b0   :  { %v662_v39 = vpop.xlane.xlu0 %661  ;;  %v953_v49 = vpop.xlane.xlu1 %952 }
 0x1b1   :  { %v1339_v9 = vadd.f32 %v1323_v22, %v662_v39  ;;  %v2791_v10 = vmax.f32 %v2788_v33, %v953_v49  ;;  %v614_v4 = vpop.xlane.xlu2 %613  ;;  %v1316_v22 = vld [vmem:[#allocation5 + $0x38] sm:$0xff] }
 0x1b2   :  { %v1291_v7 = vadd.f32 %v1275_v34, %v614_v4 }
 0x1b3   :  { %1355 = vst.msk [vmem:[#allocation5 + $0x70] sm:$0xff] %vm84_vm0, %v1339_v9  ;;  %1092 = vperm.xlu2 %2045, %v2791_v10  }
 0x1b4   :  { %1259 = vst.msk [vmem:[#allocation2 + $0x70] sm:$0xff] %vm84_vm0, %v2791_v10 }
 0x1b5   :  { %1307 = vst.msk [vmem:[#allocation4 + $0x70] sm:$0xff] %vm84_vm0, %v1291_v7  ;;  %v1324_v7 = vld [vmem:[#allocation5 + $0x78] sm:$0xff] }
 0x1b8   :  { %v600_v39 = vpop.xlane.xlu1 %599  ;;  %v939_v49 = vpop.xlane.xlu0 %938 }
 0x1b9   :  { %v1284_v63 = vadd.f32 %v1268_v20, %v600_v39  ;;  %v648_v34 = vpop.xlane.xlu2 %647  ;;  %v2803_v9 = vmax.f32 %v2800_v0, %v939_v49  ;;  %v2812_v20 = vld [vmem:[#allocation2 + $0x78] sm:$0xff] }
 0x1ba   :  { %v1332_v4 = vadd.f32 %v1316_v22, %v648_v34 }
 0x1bb   :  { %1300 = vst.msk [vmem:[#allocation4 + $0x38] sm:$0xff] %vm84_vm0, %v1284_v63  ;;  %1057 = vperm.xlu0 %2044, %v2803_v9  }
 0x1bc   :  { %1348 = vst.msk [vmem:[#allocation5 + $0x38] sm:$0xff] %vm84_vm0, %v1332_v4 }
 0x1bd   :  { %1252 = vst.msk [vmem:[#allocation2 + $0x38] sm:$0xff] %vm84_vm0, %v2803_v9 }
 0x1c0   :  { %v664_v39 = vpop.xlane.xlu1 %663  ;;  %v616_v49 = vpop.xlane.xlu0 %615 }
 0x1c1   :  { %v1340_v55 = vadd.f32 %v1324_v7, %v664_v39  ;;  %v955_v22 = vpop.xlane.xlu2 %954  ;;  %v1292_v34 = vadd.f32 %v1276_v54, %v616_v49 }
 0x1c2   :  { %v2815_v63 = vmax.f32 %v2812_v20, %v955_v22 }
 0x1c3   :  { %1356 = vst.msk [vmem:[#allocation5 + $0x78] sm:$0xff] %vm84_vm0, %v1340_v55 }
 0x1c4   :  { %1260 = vst.msk [vmem:[#allocation2 + $0x78] sm:$0xff] %vm84_vm0, %v2815_v63  ;;  %1097 = vperm.xlu1 %2046, %v2815_v63  }
 0x1c5   :  { %1308 = vst.msk [vmem:[#allocation4 + $0x78] sm:$0xff] %vm84_vm0, %v1292_v34 }
 0x1c9   :  { %v1063_v30 = vpop.permute.xlu2 %1062 }
 0x1ca   :  { %v1108_v4 = vsub.f32 %v2450_v1, %v1063_v30 }
 0x1cc   :  { %v1132_v34 = vmul.f32 1.442695, %v1108_v4 }
 0x1d1   :  { %v1033_v54 = vpop.permute.xlu2 %1032 }
 0x1d3   :  { %v1023_v11 = vpop.permute.xlu0 %1022 }
 0x1d4   :  { %v1100_v7 = vsub.f32 %v2444_v57, %v1023_v11 }
 0x1d6   :  { %v1116_v22 = vmul.f32 1.442695, %v1100_v7 }
 0x1d8   :  { %v1028_v39 = vpop.permute.xlu1 %1027 }
 0x1d9   :  { %v1101_v49 = vsub.f32 %v2483_v16, %v1028_v39  ;;  %v1038_v62 = vpop.permute.xlu2 %1037  ;;  %v1102_v16 = vsub.f32 %v2498_v21, %v1033_v54 }
 0x1da   :  { %v1103_v57 = vsub.f32 %v2516_v31, %v1038_v62 }
 0x1db   :  { %v1118_v55 = vmul.f32 1.442695, %v1101_v49  ;;  %v1120_v39 = vmul.f32 1.442695, %v1102_v16 }
 0x1dc   :  { %v1122_v11 = vmul.f32 1.442695, %v1103_v57 }
 0x1dd   :  { %2047 = vpow2.f32 %v1118_v55 }
 0x1de   :  { %2049 = vpow2.f32 %v1116_v22 }
 0x1e0   :  { %v1068_v40 = vpop.permute.xlu1 %1067 }
 0x1e1   :  { %v1109_v60 = vsub.f32 %v2485_v17, %v1068_v40 }
 0x1e3   :  { %v2048_v27 = vpop.eup %2047  ;;  %v1134_v51 = vmul.f32 1.442695, %v1109_v60 }
 0x1e4   :  { %v2050_v26 = vpop.eup %2049  ;;  %1182 = vadd.xlane.f32.xlu2 %v2048_v27 }
 0x1e5   :  { %2051 = vpow2.f32 %v1134_v51  ;;  %1180 = vadd.xlane.f32.xlu0 %v2050_v26  ;;  %v1078_v1 = vpop.permute.xlu2 %1077 }
 0x1e6   :  { %2053 = vpow2.f32 %v1132_v34  ;;  %v1111_v27 = vsub.f32 %v2559_v47, %v1078_v1 }
 0x1e7   :  { %2055 = vpow2.f32 %v1122_v11 }
 0x1e8   :  { %2057 = vpow2.f32 %v1120_v39  ;;  %v1138_v62 = vmul.f32 1.442695, %v1111_v27 }
 0x1eb   :  { %v2052_v7 = vpop.eup %2051 }
 0x1ec   :  { %1198 = vadd.xlane.f32.xlu2 %v2052_v7  ;;  %v2054_v30 = vpop.eup %2053 }
 0x1ed   :  { %v1073_v17 = vpop.permute.xlu0 %1072  ;;  %v2056_v51 = vpop.eup %2055 }
 0x1ee   :  { %1196 = vadd.xlane.f32.xlu1 %v2054_v30  ;;  %v1110_v40 = vsub.f32 %v2535_v36, %v1073_v17  ;;  %v2058_v21 = vpop.eup %2057 }
 0x1f0   :  { %v1136_v31 = vmul.f32 1.442695, %v1110_v40 }
 0x1f2   :  { %2059 = vpow2.f32 %v1136_v31 }
 0x1f3   :  { %2061 = vpow2.f32 %v1138_v62 }
 0x1f4   :  { %1186 = vadd.xlane.f32.xlu2 %v2056_v51 }
 0x1f5   :  { %v1048_v26 = vpop.permute.xlu2 %1047 }
 0x1f6   :  { %1184 = vadd.xlane.f32.xlu1 %v2058_v21  ;;  %v1105_v60 = vsub.f32 %v2577_v2, %v1048_v26 }
 0x1f8   :  { %v2060_v4 = vpop.eup %2059  ;;  %v1126_v54 = vmul.f32 1.442695, %v1105_v60 }
 0x1f9   :  { %1200 = vadd.xlane.f32.xlu0 %v2060_v4  ;;  %v2062_v49 = vpop.eup %2061 }
 0x1fa   :  { %2063 = vpow2.f32 %v1126_v54 }
 0x1fd   :  { %v1043_v22 = vpop.permute.xlu1 %1042 }
 0x1fe   :  { %1202 = vadd.xlane.f32.xlu1 %v2062_v49  ;;  %v1104_v36 = vsub.f32 %v2561_v48, %v1043_v22 }
 0x200   :  { %v1124_v47 = vmul.f32 1.442695, %v1104_v36  ;;  %v2064_v55 = vpop.eup %2063 }
 0x202   :  { %2065 = vpow2.f32 %v1124_v47  ;;  %v2846_v47 = vld [vmem:[#allocation4] sm:$0xff] }
 0x203   :  { %vm1376_vm9 = vcmp.gt.f32.partialorder %v2846_v47, 0.0 }
 0x206   :  { %1190 = vadd.xlane.f32.xlu1 %v2064_v55  ;;  %v1083_v34 = vpop.permute.xlu1 %1082  ;;  %v2955_v55 = vsub.f32 %v2659_v14, %v2666_v25  ;;  %v2957_v25 = vsub.f32 %v2692_v44, %v2695_v56  ;;  %v2959_v44 = vsub.f32 %v2704_v61, %v2707_v6 }
 0x207   :  { %v1112_v57 = vsub.f32 %v2570_v58, %v1083_v34 }
 0x208   :  { %v2066_v16 = vpop.eup %2065  ;;  %v1006_v34 = vmul.f32 1.442695, %v2955_v55  ;;  %v1008_v56 = vmul.f32 1.442695, %v2959_v44 }
 0x209   :  { %v1140_v11 = vmul.f32 1.442695, %v1112_v57  ;;  %1188 = vadd.xlane.f32.xlu0 %v2066_v16  ;;  %v1148_v16 = vld [vmem:[#allocation3] sm:$0xff] }
 0x20b   :  { %2067 = vpow2.f32 %v1140_v11 }
 0x20d   :  { %v1093_v2 = vpop.permute.xlu2 %1092 }
 0x20e   :  { %v1114_v7 = vsub.f32 %v2617_v24, %v1093_v2 }
 0x210   :  { %v1144_v39 = vmul.f32 1.442695, %v1114_v7 }
 0x211   :  { %v2068_v1 = vpop.eup %2067 }
 0x212   :  { %2069 = vpow2.f32 %v1144_v39  ;;  %1204 = vadd.xlane.f32.xlu2 %v2068_v1 }
 0x215   :  { %v1088_v27 = vpop.permute.xlu0 %1087 }
 0x216   :  { %v1113_v24 = vsub.f32 %v2595_v8, %v1088_v27  ;;  %v2954_v8 = vsub.f32 %v2628_v50, %v2631_v43  ;;  %v1149_v50 = vld [vmem:[#allocation3 + $0x8] sm:$0xff] }
 0x217   :  { %v1157_v27 = vld [vmem:[#allocation3 + $0x48] sm:$0xff] }
 0x218   :  { %v2070_v48 = vpop.eup %2069  ;;  %v1142_v21 = vmul.f32 1.442695, %v1113_v24  ;;  %v988_v36 = vmul.f32 1.442695, %v2954_v8 }
 0x219   :  { %1208 = vadd.xlane.f32.xlu1 %v2070_v48  ;;  %v994_v48 = vmul.f32 1.442695, %v2957_v25 }
 0x21e   :  { %v1053_v30 = vpop.permute.xlu1 %1052 }
 0x21f   :  { %v1106_v17 = vsub.f32 %v2612_v18, %v1053_v30 }
 0x221   :  { %v1128_v40 = vmul.f32 1.442695, %v1106_v17  ;;  %v2958_v17 = vsub.f32 %v2679_v29, %v2682_v38 }
 0x223   :  { %2071 = vpow2.f32 %v1128_v40  ;;  %v992_v40 = vmul.f32 1.442695, %v2958_v17  ;;  %v1159_v17 = vld [vmem:[#allocation3 + $0x58] sm:$0xff] }
 0x229   :  { %v2072_v58 = vpop.eup %2071 }
 0x22a   :  { %1192 = vadd.xlane.f32.xlu2 %v2072_v58 }
 0x22d   :  { %v1058_v31 = vpop.permute.xlu0 %1057 }
 0x22e   :  { %v1107_v51 = vsub.f32 %v2624_v32, %v1058_v31  ;;  %v2953_v32 = vsub.f32 %v2657_v13, %v2662_v23  ;;  %v2956_v13 = vsub.f32 %v2643_v52, %v2646_v59  ;;  %v1156_v31 = vld [vmem:[#allocation3 + $0x40] sm:$0xff] }
 0x230   :  { %v1130_v62 = vmul.f32 1.442695, %v1107_v51  ;;  %v990_v22 = vmul.f32 1.442695, %v2953_v32  ;;  %v1004_v23 = vmul.f32 1.442695, %v2956_v13 }
 0x232   :  { %2073 = vpow2.f32 %v1130_v62 }
 0x233   :  { %2075 = vpow2.f32 %v1142_v21 }
 0x236   :  { %v1098_v26 = vpop.permute.xlu1 %1097 }
 0x237   :  { %v1115_v60 = vsub.f32 %v2640_v46, %v1098_v26  ;;  %v2849_v46 = vmax.f32 %v2846_v47, 1.0 }
 0x238   :  { %v2074_v4 = vpop.eup %2073 }
 0x239   :  { %v1146_v54 = vmul.f32 1.442695, %v1115_v60  ;;  %1194 = vadd.xlane.f32.xlu0 %v2074_v4  ;;  %v2076_v18 = vpop.eup %2075  ;;  %vm1429_vm6 = vweird.f32 %v2849_v46 }
 0x23b   :  { %2077 = vpow2.f32 %v1146_v54 }
 0x23c   :  { %2079 = vpow2.f32 %v990_v22  ;;  %v1150_v22 = vld [vmem:[#allocation3 + $0x10] sm:$0xff] }
 0x23d   :  { %2081 = vpow2.f32 %v988_v36 }
 0x23e   :  { %2083 = vrcp.f32 %v2849_v46 }
 0x23f   :  { %2085 = vpow2.f32 %v1006_v34 }
 0x240   :  { %2087 = vpow2.f32 %v1004_v23  ;;  %v1433_v23 = vand.u32 2147483647, %v2849_v46 }
 0x241   :  { %v2078_v49 = vpop.eup %2077  ;;  %1206 = vadd.xlane.f32.xlu0 %v2076_v18  ;;  %2089 = vpow2.f32 %v994_v48  ;;  %v2960_v18 = vsub.f32 %v2719_v35, %v2724_v45  ;;  %v1158_v45 = vld [vmem:[#allocation3 + $0x50] sm:$0xff] }
 0x242   :  { %1210 = vadd.xlane.f32.xlu2 %v2078_v49  ;;  %v2080_v57 = vpop.eup %2079  ;;  %2091 = vpow2.f32 %v992_v40  ;;  %v1151_v49 = vld [vmem:[#allocation3 + $0x18] sm:$0xff]  ;;  %vm1434_vm10 = vcmp.eq.f32.partialorder %v1433_v23, 8.507059e+37  ;;  %v2968_v23 = vsub.f32 %v2776_v41, %v2779_v12  ;;  %v2971_v12 = vsub.f32 %v2812_v20, %v2815_v63 }
 0x243   :  { %v2082_v43 = vpop.eup %2081  ;;  %v1165_v11 = vmul.f32 %v2080_v57, %v1149_v50  ;;  %2093 = vpow2.f32 %v1008_v56  ;;  %v1010_v61 = vmul.f32 1.442695, %v2960_v18  ;;  %v1435_v57 = vand.u32 2147483648, %v2849_v46 }
 0x244   :  { %v1164_v7 = vmul.f32 %v2082_v43, %v1148_v16  ;;  %v2858_v39 = vpop.eup %2083 }
 0x245   :  { %v2086_v52 = vpop.eup %2085  ;;  %v1425_v59 = vmul.f32 %v2858_v39, %v2849_v46  ;;  %vm1430_vm7 = vweird.f32 %v2858_v39  ;;  %v1436_v25 = vor.u32 1.1754944e-38, %v1435_v57  ;;  %v1162_v57 = vld [vmem:[#allocation3 + $0x70] sm:$0xff] }
 0x246   :  { %v2088_v58 = vpop.eup %2087  ;;  %v1173_v51 = vmul.f32 %v2086_v52, %v1157_v27  ;;  %vm2884_vm8 = vmor %vm1429_vm6, %vm1430_vm7  ;;  %v1664_v52 = vld [vmem:[#allocation2] sm:$0xff] }
 0x247   :  { %v1426_v62 = vsub.f32 1.0, %v1425_v59  ;;  %v1172_v26 = vmul.f32 %v2088_v58, %v1156_v31  ;;  %v2090_v4 = vpop.eup %2089  ;;  %v1776_v31 = vld [vmem:[#allocation5] sm:$0xff] }
 0x248   :  { %v2092_v32 = vpop.eup %2091  ;;  %v1167_v8 = vmul.f32 %v2090_v4, %v1151_v49  ;;  %v1152_v4 = vld [vmem:[#allocation3 + $0x20] sm:$0xff] }
 0x249   :  { %v1427_v54 = vmul.f32 %v2858_v39, %v1426_v62  ;;  %v2094_v34 = vpop.eup %2093  ;;  %v1166_v35 = vmul.f32 %v2092_v32, %v1150_v22  ;;  %v2967_v32 = vsub.f32 %v2788_v33, %v2791_v10  ;;  %v1000_v33 = vmul.f32 1.442695, %v2968_v23 }
 0x24b   :  { %v1428_v36 = vadd.f32 %v2858_v39, %v1427_v54  ;;  %v1016_v22 = vmul.f32 1.442695, %v2967_v32 }
 0x257   :  { %v1183_v2 = vpop.xlane.xlu2 %1182 }
 0x258   :  { %v1213_v1 = vadd.f32 %v1183_v2, %v1165_v11  ;;  %v1181_v14 = vpop.xlane.xlu0 %1180  ;;  %v1432_v2 = vsel %vm2884_vm8, %v2858_v39, %v1428_v36  ;;  %v2964_v39 = vsub.f32 %v2721_v37, %v2727_v53  ;;  %v1153_v37 = vld [vmem:[#allocation3 + $0x28] sm:$0xff]  ;;  %v2966_v53 = vsub.f32 %v2740_v5, %v2743_v19  ;;  %v1160_v5 = vld [vmem:[#allocation3 + $0x60] sm:$0xff] }
 0x259   :  { %v1212_v30 = vadd.f32 %v1181_v14, %v1164_v7  ;;  %v2963_v7 = vsub.f32 %v2752_v28, %v2755_v42  ;;  %v1174_v14 = vmul.f32 %v2094_v34, %v1158_v45  ;;  %v1437_v40 = vsel %vm1434_vm10, %v1436_v25, %v1432_v2 }
 0x25a   :  { %1230 = vst.msk [vmem:[#allocation3 + $0x8] sm:$0xff] %vm84_vm0, %v1213_v1  ;;  %v996_v27 = vmul.f32 1.442695, %v2964_v39  ;;  %v2965_v42 = vmov 0.0  }
 0x25b   :  { %1229 = vst.msk [vmem:[#allocation3] sm:$0xff] %vm84_vm0, %v1212_v30  ;;  %v998_v1 = vmul.f32 1.442695, %v2963_v7  ;;  %v1392_v58 = vsel %vm1376_vm9, 1.0, %v2965_v42 }
 0x25f   :  { %v1199_v24 = vpop.xlane.xlu2 %1198 }
 0x260   :  { %v1221_v21 = vadd.f32 %v1199_v24, %v1173_v51  ;;  %v1792_v51 = vmul.f32 %v1776_v31, %v1437_v40 }
 0x261   :  { %v1197_v60 = vpop.xlane.xlu1 %1196 }
 0x262   :  { %v1680_v29 = vld [vmem:[#allocation3] sm:$0xff]  ;;  %1238 = vst.msk [vmem:[#allocation3 + $0x48] sm:$0xff] %vm84_vm0, %v1221_v21  ;;  %v1220_v38 = vadd.f32 %v1197_v60, %v1172_v26  ;;  %v1012_v60 = vmul.f32 1.442695, %v2966_v53 }
 0x263   :  { %v1696_v6 = vmax.f32 %v1680_v29, 1e-37 }
 0x264   :  { %1237 = vst.msk [vmem:[#allocation3 + $0x40] sm:$0xff] %vm84_vm0, %v1220_v38 }
 0x265   :  { %2095 = vlog2.f32 %v1696_v6 }
 0x266   :  { %2097 = vpow2.f32 %v1010_v61 }
 0x267   :  { %v1187_v55 = vpop.xlane.xlu2 %1186  ;;  %2099 = vpow2.f32 %v998_v1  ;;  %v2970_v1 = vsub.f32 %v2764_v3, %v2767_v15 }
 0x268   :  { %v1215_v13 = vadd.f32 %v1187_v55, %v1167_v8  ;;  %2101 = vpow2.f32 %v996_v27 }
 0x269   :  { %v1185_v50 = vpop.xlane.xlu1 %1184  ;;  %2103 = vpow2.f32 %v1012_v60  ;;  %v1014_v41 = vmul.f32 1.442695, %v2970_v1 }
 0x26a   :  { %1232 = vst.msk [vmem:[#allocation3 + $0x18] sm:$0xff] %vm84_vm0, %v1215_v13  ;;  %v1214_v16 = vadd.f32 %v1185_v50, %v1166_v35  ;;  %2105 = vpow2.f32 %v1016_v22  ;;  %v1154_v50 = vld [vmem:[#allocation3 + $0x30] sm:$0xff] }
 0x26b   :  { %v2096_v11 = vpop.eup %2095  ;;  %2107 = vpow2.f32 %v1000_v33 }
 0x26c   :  { %v1713_v46 = vmul.f32 0.6931472, %v2096_v11  ;;  %1231 = vst.msk [vmem:[#allocation3 + $0x10] sm:$0xff] %vm84_vm0, %v1214_v16  ;;  %v1201_v48 = vpop.xlane.xlu0 %1200  ;;  %v2098_v30 = vpop.eup %2097  ;;  %v2969_v11 = vsub.f32 %v2800_v0, %v2803_v9 }
 0x26d   :  { %v1222_v59 = vadd.f32 %v1201_v48, %v1174_v14  ;;  %v1175_v56 = vmul.f32 %v2098_v30, %v1159_v17  ;;  %v2100_v26 = vpop.eup %2099  ;;  %v1018_v14 = vmul.f32 1.442695, %v2971_v12  ;;  %v1163_v17 = vld [vmem:[#allocation3 + $0x78] sm:$0xff] }
 0x26e   :  { %v1744_v28 = vadd.f32 %v1713_v46, %v1664_v52  ;;  %v2102_v29 = vpop.eup %2101  ;;  %v1169_v38 = vmul.f32 %v2100_v26, %v1153_v37  ;;  %v1002_v2 = vmul.f32 1.442695, %v2969_v11  ;;  %v1155_v46 = vld [vmem:[#allocation3 + $0x38] sm:$0xff]  ;;  %v1161_v52 = vld [vmem:[#allocation3 + $0x68] sm:$0xff] }
 0x26f   :  { %1239 = vst.msk [vmem:[#allocation3 + $0x50] sm:$0xff] %vm84_vm0, %v1222_v59  ;;  %v1168_v61 = vmul.f32 %v2102_v29, %v1152_v4  ;;  %v2104_v8 = vpop.eup %2103 }
 0x270   :  { %v1760_v44 = vsel %vm1376_vm9, %v1744_v28, 0.0  ;;  %v1176_v19 = vmul.f32 %v2104_v8, %v1160_v5  ;;  %v2106_v34 = vpop.eup %2105  ;;  %2109 = vpow2.f32 %v1002_v2 }
 0x271   :  { %v1808_v47 = vmul.f32 %v1760_v44, %v1392_v58  ;;  %v1203_v62 = vpop.xlane.xlu1 %1202  ;;  %v1178_v13 = vmul.f32 %v2106_v34, %v1162_v57  ;;  %v2108_v10 = vpop.eup %2107  ;;  %2111 = vpow2.f32 %v1014_v41 }
 0x272   :  { %v1223_v24 = vadd.f32 %v1203_v62, %v1175_v56  ;;  %v1170_v43 = vmul.f32 %v2108_v10, %v1154_v50  ;;  %2113 = vpow2.f32 %v1018_v14 }
 0x273   :  { %v1824_v21 = vsub.f32 %v1792_v51, %v1808_v47 }
 0x274   :  { %1240 = vst.msk [vmem:[#allocation3 + $0x58] sm:$0xff] %vm84_vm0, %v1223_v24 }
 0x275   :  { %1906 = vst.msk [vmem:[%s2937_s4] sm:$0xff] %vm84_vm0, %v1824_v21 }
 0x276   :  { %v2110_v25 = vpop.eup %2109 }
 0x277   :  { %v1171_v48 = vmul.f32 %v2110_v25, %v1155_v46  ;;  %v2112_v9 = vpop.eup %2111 }
 0x278   :  { %v2114_v59 = vpop.eup %2113  ;;  %v1177_v40 = vmul.f32 %v2112_v9, %v1161_v52 }
 0x279   :  { %v1191_v54 = vpop.xlane.xlu1 %1190  ;;  %v1179_v3 = vmul.f32 %v2114_v59, %v1163_v17 }
 0x27a   :  { %v1217_v18 = vadd.f32 %v1191_v54, %v1169_v38 }
 0x27c   :  { %1234 = vst.msk [vmem:[#allocation3 + $0x28] sm:$0xff] %vm84_vm0, %v1217_v18  ;;  %v1189_v6 = vpop.xlane.xlu0 %1188 }
 0x27d   :  { %v1216_v49 = vadd.f32 %v1189_v6, %v1168_v61 }
 0x27f   :  { %1233 = vst.msk [vmem:[#allocation3 + $0x20] sm:$0xff] %vm84_vm0, %v1216_v49 }
 0x285   :  { %v1205_v36 = vpop.xlane.xlu2 %1204 }
 0x286   :  { %v1224_v55 = vadd.f32 %v1205_v36, %v1176_v19 }
 0x288   :  { %1241 = vst.msk [vmem:[#allocation3 + $0x60] sm:$0xff] %vm84_vm0, %v1224_v55 }
 0x28c   :  { %v1209_v35 = vpop.xlane.xlu1 %1208 }
 0x28d   :  { %v1226_v45 = vadd.f32 %v1209_v35, %v1178_v13 }
 0x28f   :  { %1243 = vst.msk [vmem:[#allocation3 + $0x70] sm:$0xff] %vm84_vm0, %v1226_v45 }
 0x29d   :  { %v1193_v16 = vpop.xlane.xlu2 %1192 }
 0x29e   :  { %v1218_v7 = vadd.f32 %v1193_v16, %v1170_v43 }
 0x2a0   :  { %1235 = vst.msk [vmem:[#allocation3 + $0x30] sm:$0xff] %vm84_vm0, %v1218_v7 }
 0x2ac   :  { %v1195_v30 = vpop.xlane.xlu0 %1194 }
 0x2ad   :  { %v1219_v0 = vadd.f32 %v1195_v30, %v1171_v48 }
 0x2af   :  { %1236 = vst.msk [vmem:[#allocation3 + $0x38] sm:$0xff] %vm84_vm0, %v1219_v0 }
 0x2b4   :  { %v1207_v15 = vpop.xlane.xlu0 %1206 }
 0x2b5   :  { %v1211_v39 = vpop.xlane.xlu2 %1210  ;;  %v1225_v27 = vadd.f32 %v1207_v15, %v1177_v40 }
 0x2b6   :  { %v1227_v20 = vadd.f32 %v1211_v39, %v1179_v3 }
 0x2b7   :  { %1242 = vst.msk [vmem:[#allocation3 + $0x68] sm:$0xff] %vm84_vm0, %v1225_v27 }
 0x2b8   :  { %1244 = vst.msk [vmem:[#allocation3 + $0x78] sm:$0xff] %vm84_vm0, %v1227_v20 }
 0x2b9   :  { %1926 = vsyncpa [#allocation7], 1 }
 0x2ba   :  { %1927 = vsyncpa [#allocation9], 1 }
 0x2bb   :  { %1928 = vsyncpa [#allocation12], 1 }

</bundles_post_ra>
